<compile_context>
chip_gen: v7x
topology: tpu7x:2x2x1
jax: 0.10.0
libtpu: 0.0.40
codegen_flags: <defaults>
</compile_context>

<pallas_src>
import jax
import jax.numpy as jnp
from jax import lax
from jax.experimental import pallas as pl
from jax.experimental.pallas import tpu as pltpu

# ---- sizes (small, consistent with the module's __init__) ----
N = 4        # batch
NP = 8       # batch padded to one full sublane group
T = 8        # sequence length
E = 16       # args.embedding_dim
H = 32       # args.hidden_size
R = 32       # args.total_regions
RP = 128     # regions padded to a full lane width for the kernel output
N_HOURS = 24 # t_enc table size

BF16 = jnp.bfloat16

# weight-slab row offsets (all sub-slabs are 128 lanes wide, bf16)
_GI, _WHH, _W1S, _PRET, _W2 = 0, 32, 64, 96, 128
W_ROWS = 256


def policy_high_fwd_kernel(ids_ref, w_ref, b_ref, out_ref):
    """All tensors fully resident in VMEM (total footprint < 128 KB).

    ids_ref : (T*NP, 2) int32  per-row [region_id, hour], time-major, batch padded
    w_ref   : (256, 128) bf16  packed weight slab:
                rows   0: 32  gi_table   = emb_region @ W_ih^T    (gates padded 96->128)
                rows  32: 64  W_hh^T                              (gates padded 96->128)
                rows  64: 96  W1[:H]  (state slice of actor L1)   (lanes padded 32->128)
                rows  96:128  pret_table = t_table @ W1[H:]       (rows 24->32, lanes 32->128)
                rows 128:256  W2 (actor L2), rows/lanes padded 32->128
    b_ref   : (4, 128) f32     packed bias slab: [b_ih | b_hh | b1 | b2(-1e9 pad)]
    out_ref : (T*NP, RP) f32   lane-dense log-softmax outputs
    """
    # ---- static slices of the packed slabs ----
    gi_tbl   = w_ref[_GI:_GI + 32, :]        # (R,  128) bf16
    whh      = w_ref[_WHH:_WHH + 32, :]      # (H,  128) bf16  (resident across recurrence)
    w1s      = w_ref[_W1S:_W1S + 32, :]      # (H,  128) bf16
    pret_tbl = w_ref[_PRET:_PRET + 32, :]    # (32, 128) bf16
    w2       = w_ref[_W2:_W2 + 128, :]       # (128,128) bf16 (rows >= H are zero)
    bih = b_ref[0:1, :]                      # (1, 128) f32
    bhh = b_ref[1:2, :]
    b1  = b_ref[2:3, :]
    b2  = b_ref[3:4, :]                      # pad lanes hold -1e9

    # ---- prologue: in-kernel embedding gathers via one-hot matmuls (off the
    #      serial path), fused with the input projections ----
    ids = ids_ref[...]                                            # (T*NP, 2) int32
    iota = lax.broadcasted_iota(jnp.int32, (T * NP, 32), 1)
    oh_r = (iota == ids[:, 0:1]).astype(BF16)                     # region one-hot (64, 32)
    oh_h = (iota == ids[:, 1:2]).astype(BF16)                     # hour   one-hot (64, 32)

    # GRU input projection for ALL steps in one matmul (gather + project fused).
    gi_all = jnp.dot(oh_r, gi_tbl, preferred_element_type=jnp.float32) + bih   # (64, 128)
    # t_emb branch of the actor MLP, also hoisted ahead of the serial chain.
    pre_t = jnp.dot(oh_h, pret_tbl, preferred_element_type=jnp.float32) + b1   # (64, 128)

    # Pre-split the gate slabs once (r|z fused, n separate); loop only slices rows.
    gi_rz = gi_all[:, :2 * H]                                     # (64, 64)
    gi_n = gi_all[:, 2 * H:3 * H]                                 # (64, 32)

    # ---- GRU recurrence (PyTorch nn.GRU cell, gate order r, z, n) ----
    # Fully unrolled; hidden state and all step outputs stay in vregs (f32).
    # NOTE: explicit pltpu.matmul_push_rhs/acc/pop could keep W_hh staged in the MXU
    # across steps; jnp.dot is kept here for lowering robustness.
    h = jnp.zeros((NP, H), jnp.float32)
    hs = []
    for t in range(T):
        lo, hi = t * NP, (t + 1) * NP
        gh = jnp.dot(h.astype(BF16), whh,
                     preferred_element_type=jnp.float32) + bhh    # (NP, 128)
        rz = jax.nn.sigmoid(gi_rz[lo:hi, :] + gh[:, :2 * H])      # fused r+z sigmoid
        r = rz[:, :H]
        z = rz[:, H:2 * H]
        n = jnp.tanh(gi_n[lo:hi, :] + r * gh[:, 2 * H:3 * H])
        h = (1.0 - z) * n + z * h
        hs.append(h)

    s2 = jnp.concatenate(hs, axis=0).astype(BF16)                 # (T*NP, H)

    # ---- actor_individual MLP (Linear -> tanh -> Linear); concat avoided by the
    #      pre-split weight slices; pad lanes of h1 are exactly 0 and W2 pad rows are 0 ----
    h1 = jnp.tanh(jnp.dot(s2, w1s, preferred_element_type=jnp.float32) + pre_t)  # (64, 128)
    logits = jnp.dot(h1.astype(BF16), w2,
                     preferred_element_type=jnp.float32) + b2                    # (64, 128)

    # ---- LogSoftmax over the last dim (padded lanes carry -1e9 -> exp == 0) ----
    m = jnp.max(logits, axis=-1, keepdims=True)
    lse = m + jnp.log(jnp.sum(jnp.exp(logits - m), axis=-1, keepdims=True))
    out_ref[...] = logits - lse


def make_params(key):
    ks = jax.random.split(key, 9)
    p = {}
    p["emb_region"] = 0.1 * jax.random.normal(ks[0], (R, E), jnp.float32)
    p["t_table"] = 0.1 * jax.random.normal(ks[1], (N_HOURS, E), jnp.float32)
    # GRU (PyTorch layout: weight_ih (3H, E), weight_hh (3H, H), biases (3H,))
    p["w_ih"] = 0.2 * jax.random.normal(ks[2], (3 * H, E), jnp.float32)
    p["w_hh"] = 0.2 * jax.random.normal(ks[3], (3 * H, H), jnp.float32)
    p["b_ih"] = 0.05 * jax.random.normal(ks[4], (3 * H,), jnp.float32)
    p["b_hh"] = 0.05 * jax.random.normal(ks[5], (3 * H,), jnp.float32)
    # actor_individual MLP: Linear(H+E -> H), Linear(H -> R); stored as x @ W + b
    p["w1"] = 0.2 * jax.random.normal(ks[6], (H + E, H), jnp.float32)
    p["b1"] = jnp.zeros((H,), jnp.float32)
    p["w2"] = 0.2 * jax.random.normal(ks[7], (H, R), jnp.float32)
    p["b2"] = jnp.zeros((R,), jnp.float32)
    return p


def prepare_params(p):
    """One-time weight prep: fuse embedding tables with the first projections,
    transpose/cast/pad, and pack everything into two contiguous slabs."""
    gi_tbl = p["emb_region"] @ p["w_ih"].T          # (R, 3H)  gather+project fused
    pret_tbl = p["t_table"] @ p["w1"][H:]           # (24, H)

    wslab = jnp.zeros((W_ROWS, 128), BF16)
    wslab = wslab.at[_GI:_GI + R, 0:3 * H].set(gi_tbl.astype(BF16))
    wslab = wslab.at[_WHH:_WHH + H, 0:3 * H].set(p["w_hh"].T.astype(BF16))
    wslab = wslab.at[_W1S:_W1S + H, 0:H].set(p["w1"][:H].astype(BF16))
    wslab = wslab.at[_PRET:_PRET + N_HOURS, 0:H].set(pret_tbl.astype(BF16))
    wslab = wslab.at[_W2:_W2 + H, 0:R].set(p["w2"].astype(BF16))

    bslab = jnp.zeros((4, 128), jnp.float32)
    bslab = bslab.at[0, 0:3 * H].set(p["b_ih"])
    bslab = bslab.at[1, 0:3 * H].set(p["b_hh"])
    bslab = bslab.at[2, 0:H].set(p["b1"])
    bslab = bslab.at[3, :].set(jnp.full((128,), -1e9, jnp.float32))
    bslab = bslab.at[3, 0:R].set(p["b2"])
    return {"wslab": wslab, "bslab": bslab}


def policy_high_forward(inputs, length, prep):
    """inputs: (N, T) int32 region ids; length: (N, T) int32 hour counters."""
    # Integer-only id layout prep: time-major, batch padded N -> NP (dead rows = id 0).
    rid = jnp.zeros((NP, T), jnp.int32).at[:N, :].set(inputs.astype(jnp.int32))
    hid = jnp.zeros((NP, T), jnp.int32).at[:N, :].set((length % 24).astype(jnp.int32))
    ids = jnp.stack([rid.T.reshape(T * NP), hid.T.reshape(T * NP)], axis=-1)  # (T*NP, 2)

    vmem = pl.BlockSpec(memory_space=pltpu.MemorySpace.VMEM)
    out_flat = pl.pallas_call(
        policy_high_fwd_kernel,
        out_shape=jax.ShapeDtypeStruct((T * NP, RP), jnp.float32),
        in_specs=[vmem, vmem, vmem],
        out_specs=vmem,
    )(ids, prep["wslab"], prep["bslab"])

    out = out_flat.reshape(T, NP, RP)[:, :N, :R]    # strip batch / lane padding
    return jnp.transpose(out, (1, 0, 2))            # (N, T, R)


def policy_high_forward_ref(inputs, length, p):
    """Pure-JAX reference of Policy_High.forward (is_week=False)."""
    x = p["emb_region"][inputs]
    t_emb = p["t_table"][length % 24]

    def cell(h, xt):
        gi = xt @ p["w_ih"].T + p["b_ih"]
        gh = h @ p["w_hh"].T + p["b_hh"]
        r = jax.nn.sigmoid(gi[:, :H] + gh[:, :H])
        z = jax.nn.sigmoid(gi[:, H:2 * H] + gh[:, H:2 * H])
        n = jnp.tanh(gi[:, 2 * H:] + r * gh[:, 2 * H:])
        h_new = (1.0 - z) * n + z * h
        return h_new, h_new

    h0 = jnp.zeros((inputs.shape[0], H), jnp.float32)
    _, states = lax.scan(cell, h0, jnp.transpose(x, (1, 0, 2)))   # (T, N, H)
    states = jnp.transpose(states, (1, 0, 2))                     # (N, T, H)
    feats = jnp.concatenate([states, t_emb], axis=-1)
    h1 = jnp.tanh(feats @ p["w1"] + p["b1"])
    logits = h1 @ p["w2"] + p["b2"]
    return jax.nn.log_softmax(logits, axis=-1)


if __name__ == "__main__":
    key = jax.random.PRNGKey(0)
    k_p, k_in, k_len = jax.random.split(key, 3)
    params = make_params(k_p)
    prep = prepare_params(params)          # one-time param prep (not per-call)

    inputs = jax.random.randint(k_in, (N, T), 0, R, dtype=jnp.int32)     # region ids
    length = jax.random.randint(k_len, (N, T), 0, 200, dtype=jnp.int32)  # hour counters

    out = policy_high_forward(inputs, length, prep)
    out = jax.block_until_ready(out)

    ref = policy_high_forward_ref(inputs, length, params)
    assert out.shape == (N, T, R), out.shape
    assert bool(jnp.isfinite(out).all())
    assert bool(jnp.allclose(out, ref, atol=5e-2, rtol=5e-2)), (
        float(jnp.max(jnp.abs(out - ref))))
    print("KERNEL_OK")
</pallas_src>

<mosaic_0001>
module attributes {stable_mosaic.version = 11 : i64} {
  func.func @policy_high_fwd_kernel(%arg0: memref<64x2xi32, #tpu.memory_space<vmem>>, %arg1: memref<256x128xbf16, #tpu.memory_space<vmem>>, %arg2: memref<4x128xf32, #tpu.memory_space<vmem>>, %arg3: memref<64x128xf32, #tpu.memory_space<vmem>>) attributes {dimension_semantics = [], scalar_prefetch = 0 : i64, scratch_operands = 0 : i64, tpu.core_type = #tpu.core_type<tc>} {
    %c0 = arith.constant 0 : index
    %c0_0 = arith.constant 0 : index
    %0 = vector.load %arg1[%c0, %c0_0] : memref<256x128xbf16, #tpu.memory_space<vmem>>, vector<32x128xbf16>
    %c32 = arith.constant 32 : index
    %c0_1 = arith.constant 0 : index
    %1 = vector.load %arg1[%c32, %c0_1] : memref<256x128xbf16, #tpu.memory_space<vmem>>, vector<32x128xbf16>
    %c64 = arith.constant 64 : index
    %c0_2 = arith.constant 0 : index
    %2 = vector.load %arg1[%c64, %c0_2] : memref<256x128xbf16, #tpu.memory_space<vmem>>, vector<32x128xbf16>
    %c96 = arith.constant 96 : index
    %c0_3 = arith.constant 0 : index
    %3 = vector.load %arg1[%c96, %c0_3] : memref<256x128xbf16, #tpu.memory_space<vmem>>, vector<32x128xbf16>
    %c128 = arith.constant 128 : index
    %c0_4 = arith.constant 0 : index
    %4 = vector.load %arg1[%c128, %c0_4] : memref<256x128xbf16, #tpu.memory_space<vmem>>, vector<128x128xbf16>
    %c0_5 = arith.constant 0 : index
    %c0_6 = arith.constant 0 : index
    %5 = vector.load %arg2[%c0_5, %c0_6] : memref<4x128xf32, #tpu.memory_space<vmem>>, vector<1x128xf32>
    %c1 = arith.constant 1 : index
    %c0_7 = arith.constant 0 : index
    %6 = vector.load %arg2[%c1, %c0_7] : memref<4x128xf32, #tpu.memory_space<vmem>>, vector<1x128xf32>
    %c2 = arith.constant 2 : index
    %c0_8 = arith.constant 0 : index
    %7 = vector.load %arg2[%c2, %c0_8] : memref<4x128xf32, #tpu.memory_space<vmem>>, vector<1x128xf32>
    %c3 = arith.constant 3 : index
    %c0_9 = arith.constant 0 : index
    %8 = vector.load %arg2[%c3, %c0_9] : memref<4x128xf32, #tpu.memory_space<vmem>>, vector<1x128xf32>
    %c0_10 = arith.constant 0 : index
    %c0_11 = arith.constant 0 : index
    %9 = vector.load %arg0[%c0_10, %c0_11] : memref<64x2xi32, #tpu.memory_space<vmem>>, vector<64x2xi32>
    %10 = tpu.iota {dimensions = array<i32: 1>} : vector<64x32xi32>
    %11 = vector.extract_strided_slice %9 {offsets = [0, 0], sizes = [64, 1], strides = [1, 1]} : vector<64x2xi32> to vector<64x1xi32>
    %12 = vector.broadcast %11 : vector<64x1xi32> to vector<64x32xi32>
    %13 = arith.cmpi eq, %10, %12 : vector<64x32xi32>
    %14 = arith.extui %13 : vector<64x32xi1> to vector<64x32xi32>
    %15 = arith.sitofp %14 : vector<64x32xi32> to vector<64x32xf32>
    %16 = arith.truncf %15 : vector<64x32xf32> to vector<64x32xbf16>
    %17 = vector.extract_strided_slice %9 {offsets = [0, 1], sizes = [64, 1], strides = [1, 1]} : vector<64x2xi32> to vector<64x1xi32>
    %18 = vector.broadcast %17 : vector<64x1xi32> to vector<64x32xi32>
    %19 = arith.cmpi eq, %10, %18 : vector<64x32xi32>
    %20 = arith.extui %19 : vector<64x32xi1> to vector<64x32xi32>
    %21 = arith.sitofp %20 : vector<64x32xi32> to vector<64x32xf32>
    %22 = arith.truncf %21 : vector<64x32xf32> to vector<64x32xbf16>
    %cst = arith.constant dense<0.000000e+00> : vector<64x128xf32>
    %23 = tpu.matmul %16, %0, %cst {dimension_numbers = #tpu.dot_dimension_numbers<[1], [0], [0], [1], [0, 0, 1, 1], [], []>} : vector<64x32xbf16>, vector<32x128xbf16>, vector<64x128xf32> -> vector<64x128xf32>
    %24 = vector.broadcast %5 : vector<1x128xf32> to vector<64x128xf32>
    %25 = arith.addf %23, %24 : vector<64x128xf32>
    %cst_12 = arith.constant dense<0.000000e+00> : vector<64x128xf32>
    %26 = tpu.matmul %22, %3, %cst_12 {dimension_numbers = #tpu.dot_dimension_numbers<[1], [0], [0], [1], [0, 0, 1, 1], [], []>} : vector<64x32xbf16>, vector<32x128xbf16>, vector<64x128xf32> -> vector<64x128xf32>
    %27 = vector.broadcast %7 : vector<1x128xf32> to vector<64x128xf32>
    %28 = arith.addf %26, %27 : vector<64x128xf32>
    %29 = vector.extract_strided_slice %25 {offsets = [0, 0], sizes = [64, 64], strides = [1, 1]} : vector<64x128xf32> to vector<64x64xf32>
    %30 = vector.extract_strided_slice %25 {offsets = [0, 64], sizes = [64, 32], strides = [1, 1]} : vector<64x128xf32> to vector<64x32xf32>
    %cst_13 = arith.constant 0.000000e+00 : f32
    %31 = vector.broadcast %cst_13 : f32 to vector<8x32xf32>
    %32 = arith.truncf %31 : vector<8x32xf32> to vector<8x32xbf16>
    %cst_14 = arith.constant dense<0.000000e+00> : vector<8x128xf32>
    %33 = tpu.matmul %32, %1, %cst_14 {dimension_numbers = #tpu.dot_dimension_numbers<[1], [0], [0], [1], [0, 0, 1, 1], [], []>} : vector<8x32xbf16>, vector<32x128xbf16>, vector<8x128xf32> -> vector<8x128xf32>
    %34 = vector.broadcast %6 : vector<1x128xf32> to vector<8x128xf32>
    %35 = arith.addf %33, %34 : vector<8x128xf32>
    %36 = vector.extract_strided_slice %29 {offsets = [0, 0], sizes = [8, 64], strides = [1, 1]} : vector<64x64xf32> to vector<8x64xf32>
    %37 = vector.extract_strided_slice %35 {offsets = [0, 0], sizes = [8, 64], strides = [1, 1]} : vector<8x128xf32> to vector<8x64xf32>
    %38 = arith.addf %36, %37 : vector<8x64xf32>
    %39 = arith.negf %38 : vector<8x64xf32>
    %40 = math.exp %39 : vector<8x64xf32>
    %cst_15 = arith.constant 1.000000e+00 : f32
    %41 = vector.broadcast %cst_15 : f32 to vector<8x64xf32>
    %42 = arith.addf %41, %40 : vector<8x64xf32>
    %43 = arith.divf %41, %42 : vector<8x64xf32>
    %44 = vector.extract_strided_slice %43 {offsets = [0, 0], sizes = [8, 32], strides = [1, 1]} : vector<8x64xf32> to vector<8x32xf32>
    %45 = vector.extract_strided_slice %43 {offsets = [0, 32], sizes = [8, 32], strides = [1, 1]} : vector<8x64xf32> to vector<8x32xf32>
    %46 = vector.extract_strided_slice %30 {offsets = [0, 0], sizes = [8, 32], strides = [1, 1]} : vector<64x32xf32> to vector<8x32xf32>
    %47 = vector.extract_strided_slice %35 {offsets = [0, 64], sizes = [8, 32], strides = [1, 1]} : vector<8x128xf32> to vector<8x32xf32>
    %48 = arith.mulf %44, %47 : vector<8x32xf32>
    %49 = arith.addf %46, %48 : vector<8x32xf32>
    %50 = math.tanh %49 : vector<8x32xf32>
    %cst_16 = arith.constant 1.000000e+00 : f32
    %51 = vector.broadcast %cst_16 : f32 to vector<8x32xf32>
    %52 = arith.subf %51, %45 : vector<8x32xf32>
    %53 = arith.mulf %52, %50 : vector<8x32xf32>
    %54 = arith.mulf %45, %31 : vector<8x32xf32>
    %55 = arith.addf %53, %54 : vector<8x32xf32>
    %56 = arith.truncf %55 : vector<8x32xf32> to vector<8x32xbf16>
    %cst_17 = arith.constant dense<0.000000e+00> : vector<8x128xf32>
    %57 = tpu.matmul %56, %1, %cst_17 {dimension_numbers = #tpu.dot_dimension_numbers<[1], [0], [0], [1], [0, 0, 1, 1], [], []>} : vector<8x32xbf16>, vector<32x128xbf16>, vector<8x128xf32> -> vector<8x128xf32>
    %58 = vector.broadcast %6 : vector<1x128xf32> to vector<8x128xf32>
    %59 = arith.addf %57, %58 : vector<8x128xf32>
    %60 = vector.extract_strided_slice %29 {offsets = [8, 0], sizes = [8, 64], strides = [1, 1]} : vector<64x64xf32> to vector<8x64xf32>
    %61 = vector.extract_strided_slice %59 {offsets = [0, 0], sizes = [8, 64], strides = [1, 1]} : vector<8x128xf32> to vector<8x64xf32>
    %62 = arith.addf %60, %61 : vector<8x64xf32>
    %63 = arith.negf %62 : vector<8x64xf32>
    %64 = math.exp %63 : vector<8x64xf32>
    %cst_18 = arith.constant 1.000000e+00 : f32
    %65 = vector.broadcast %cst_18 : f32 to vector<8x64xf32>
    %66 = arith.addf %65, %64 : vector<8x64xf32>
    %67 = arith.divf %65, %66 : vector<8x64xf32>
    %68 = vector.extract_strided_slice %67 {offsets = [0, 0], sizes = [8, 32], strides = [1, 1]} : vector<8x64xf32> to vector<8x32xf32>
    %69 = vector.extract_strided_slice %67 {offsets = [0, 32], sizes = [8, 32], strides = [1, 1]} : vector<8x64xf32> to vector<8x32xf32>
    %70 = vector.extract_strided_slice %30 {offsets = [8, 0], sizes = [8, 32], strides = [1, 1]} : vector<64x32xf32> to vector<8x32xf32>
    %71 = vector.extract_strided_slice %59 {offsets = [0, 64], sizes = [8, 32], strides = [1, 1]} : vector<8x128xf32> to vector<8x32xf32>
    %72 = arith.mulf %68, %71 : vector<8x32xf32>
    %73 = arith.addf %70, %72 : vector<8x32xf32>
    %74 = math.tanh %73 : vector<8x32xf32>
    %cst_19 = arith.constant 1.000000e+00 : f32
    %75 = vector.broadcast %cst_19 : f32 to vector<8x32xf32>
    %76 = arith.subf %75, %69 : vector<8x32xf32>
    %77 = arith.mulf %76, %74 : vector<8x32xf32>
    %78 = arith.mulf %69, %55 : vector<8x32xf32>
    %79 = arith.addf %77, %78 : vector<8x32xf32>
    %80 = arith.truncf %79 : vector<8x32xf32> to vector<8x32xbf16>
    %cst_20 = arith.constant dense<0.000000e+00> : vector<8x128xf32>
    %81 = tpu.matmul %80, %1, %cst_20 {dimension_numbers = #tpu.dot_dimension_numbers<[1], [0], [0], [1], [0, 0, 1, 1], [], []>} : vector<8x32xbf16>, vector<32x128xbf16>, vector<8x128xf32> -> vector<8x128xf32>
    %82 = vector.broadcast %6 : vector<1x128xf32> to vector<8x128xf32>
    %83 = arith.addf %81, %82 : vector<8x128xf32>
    %84 = vector.extract_strided_slice %29 {offsets = [16, 0], sizes = [8, 64], strides = [1, 1]} : vector<64x64xf32> to vector<8x64xf32>
    %85 = vector.extract_strided_slice %83 {offsets = [0, 0], sizes = [8, 64], strides = [1, 1]} : vector<8x128xf32> to vector<8x64xf32>
    %86 = arith.addf %84, %85 : vector<8x64xf32>
    %87 = arith.negf %86 : vector<8x64xf32>
    %88 = math.exp %87 : vector<8x64xf32>
    %cst_21 = arith.constant 1.000000e+00 : f32
    %89 = vector.broadcast %cst_21 : f32 to vector<8x64xf32>
    %90 = arith.addf %89, %88 : vector<8x64xf32>
    %91 = arith.divf %89, %90 : vector<8x64xf32>
    %92 = vector.extract_strided_slice %91 {offsets = [0, 0], sizes = [8, 32], strides = [1, 1]} : vector<8x64xf32> to vector<8x32xf32>
    %93 = vector.extract_strided_slice %91 {offsets = [0, 32], sizes = [8, 32], strides = [1, 1]} : vector<8x64xf32> to vector<8x32xf32>
    %94 = vector.extract_strided_slice %30 {offsets = [16, 0], sizes = [8, 32], strides = [1, 1]} : vector<64x32xf32> to vector<8x32xf32>
    %95 = vector.extract_strided_slice %83 {offsets = [0, 64], sizes = [8, 32], strides = [1, 1]} : vector<8x128xf32> to vector<8x32xf32>
    %96 = arith.mulf %92, %95 : vector<8x32xf32>
    %97 = arith.addf %94, %96 : vector<8x32xf32>
    %98 = math.tanh %97 : vector<8x32xf32>
    %cst_22 = arith.constant 1.000000e+00 : f32
    %99 = vector.broadcast %cst_22 : f32 to vector<8x32xf32>
    %100 = arith.subf %99, %93 : vector<8x32xf32>
    %101 = arith.mulf %100, %98 : vector<8x32xf32>
    %102 = arith.mulf %93, %79 : vector<8x32xf32>
    %103 = arith.addf %101, %102 : vector<8x32xf32>
    %104 = arith.truncf %103 : vector<8x32xf32> to vector<8x32xbf16>
    %cst_23 = arith.constant dense<0.000000e+00> : vector<8x128xf32>
    %105 = tpu.matmul %104, %1, %cst_23 {dimension_numbers = #tpu.dot_dimension_numbers<[1], [0], [0], [1], [0, 0, 1, 1], [], []>} : vector<8x32xbf16>, vector<32x128xbf16>, vector<8x128xf32> -> vector<8x128xf32>
    %106 = vector.broadcast %6 : vector<1x128xf32> to vector<8x128xf32>
    %107 = arith.addf %105, %106 : vector<8x128xf32>
    %108 = vector.extract_strided_slice %29 {offsets = [24, 0], sizes = [8, 64], strides = [1, 1]} : vector<64x64xf32> to vector<8x64xf32>
    %109 = vector.extract_strided_slice %107 {offsets = [0, 0], sizes = [8, 64], strides = [1, 1]} : vector<8x128xf32> to vector<8x64xf32>
    %110 = arith.addf %108, %109 : vector<8x64xf32>
    %111 = arith.negf %110 : vector<8x64xf32>
    %112 = math.exp %111 : vector<8x64xf32>
    %cst_24 = arith.constant 1.000000e+00 : f32
    %113 = vector.broadcast %cst_24 : f32 to vector<8x64xf32>
    %114 = arith.addf %113, %112 : vector<8x64xf32>
    %115 = arith.divf %113, %114 : vector<8x64xf32>
    %116 = vector.extract_strided_slice %115 {offsets = [0, 0], sizes = [8, 32], strides = [1, 1]} : vector<8x64xf32> to vector<8x32xf32>
    %117 = vector.extract_strided_slice %115 {offsets = [0, 32], sizes = [8, 32], strides = [1, 1]} : vector<8x64xf32> to vector<8x32xf32>
    %118 = vector.extract_strided_slice %30 {offsets = [24, 0], sizes = [8, 32], strides = [1, 1]} : vector<64x32xf32> to vector<8x32xf32>
    %119 = vector.extract_strided_slice %107 {offsets = [0, 64], sizes = [8, 32], strides = [1, 1]} : vector<8x128xf32> to vector<8x32xf32>
    %120 = arith.mulf %116, %119 : vector<8x32xf32>
    %121 = arith.addf %118, %120 : vector<8x32xf32>
    %122 = math.tanh %121 : vector<8x32xf32>
    %cst_25 = arith.constant 1.000000e+00 : f32
    %123 = vector.broadcast %cst_25 : f32 to vector<8x32xf32>
    %124 = arith.subf %123, %117 : vector<8x32xf32>
    %125 = arith.mulf %124, %122 : vector<8x32xf32>
    %126 = arith.mulf %117, %103 : vector<8x32xf32>
    %127 = arith.addf %125, %126 : vector<8x32xf32>
    %128 = arith.truncf %127 : vector<8x32xf32> to vector<8x32xbf16>
    %cst_26 = arith.constant dense<0.000000e+00> : vector<8x128xf32>
    %129 = tpu.matmul %128, %1, %cst_26 {dimension_numbers = #tpu.dot_dimension_numbers<[1], [0], [0], [1], [0, 0, 1, 1], [], []>} : vector<8x32xbf16>, vector<32x128xbf16>, vector<8x128xf32> -> vector<8x128xf32>
    %130 = vector.broadcast %6 : vector<1x128xf32> to vector<8x128xf32>
    %131 = arith.addf %129, %130 : vector<8x128xf32>
    %132 = vector.extract_strided_slice %29 {offsets = [32, 0], sizes = [8, 64], strides = [1, 1]} : vector<64x64xf32> to vector<8x64xf32>
    %133 = vector.extract_strided_slice %131 {offsets = [0, 0], sizes = [8, 64], strides = [1, 1]} : vector<8x128xf32> to vector<8x64xf32>
    %134 = arith.addf %132, %133 : vector<8x64xf32>
    %135 = arith.negf %134 : vector<8x64xf32>
    %136 = math.exp %135 : vector<8x64xf32>
    %cst_27 = arith.constant 1.000000e+00 : f32
    %137 = vector.broadcast %cst_27 : f32 to vector<8x64xf32>
    %138 = arith.addf %137, %136 : vector<8x64xf32>
    %139 = arith.divf %137, %138 : vector<8x64xf32>
    %140 = vector.extract_strided_slice %139 {offsets = [0, 0], sizes = [8, 32], strides = [1, 1]} : vector<8x64xf32> to vector<8x32xf32>
    %141 = vector.extract_strided_slice %139 {offsets = [0, 32], sizes = [8, 32], strides = [1, 1]} : vector<8x64xf32> to vector<8x32xf32>
    %142 = vector.extract_strided_slice %30 {offsets = [32, 0], sizes = [8, 32], strides = [1, 1]} : vector<64x32xf32> to vector<8x32xf32>
    %143 = vector.extract_strided_slice %131 {offsets = [0, 64], sizes = [8, 32], strides = [1, 1]} : vector<8x128xf32> to vector<8x32xf32>
    %144 = arith.mulf %140, %143 : vector<8x32xf32>
    %145 = arith.addf %142, %144 : vector<8x32xf32>
    %146 = math.tanh %145 : vector<8x32xf32>
    %cst_28 = arith.constant 1.000000e+00 : f32
    %147 = vector.broadcast %cst_28 : f32 to vector<8x32xf32>
    %148 = arith.subf %147, %141 : vector<8x32xf32>
    %149 = arith.mulf %148, %146 : vector<8x32xf32>
    %150 = arith.mulf %141, %127 : vector<8x32xf32>
    %151 = arith.addf %149, %150 : vector<8x32xf32>
    %152 = arith.truncf %151 : vector<8x32xf32> to vector<8x32xbf16>
    %cst_29 = arith.constant dense<0.000000e+00> : vector<8x128xf32>
    %153 = tpu.matmul %152, %1, %cst_29 {dimension_numbers = #tpu.dot_dimension_numbers<[1], [0], [0], [1], [0, 0, 1, 1], [], []>} : vector<8x32xbf16>, vector<32x128xbf16>, vector<8x128xf32> -> vector<8x128xf32>
    %154 = vector.broadcast %6 : vector<1x128xf32> to vector<8x128xf32>
    %155 = arith.addf %153, %154 : vector<8x128xf32>
    %156 = vector.extract_strided_slice %29 {offsets = [40, 0], sizes = [8, 64], strides = [1, 1]} : vector<64x64xf32> to vector<8x64xf32>
    %157 = vector.extract_strided_slice %155 {offsets = [0, 0], sizes = [8, 64], strides = [1, 1]} : vector<8x128xf32> to vector<8x64xf32>
    %158 = arith.addf %156, %157 : vector<8x64xf32>
    %159 = arith.negf %158 : vector<8x64xf32>
    %160 = math.exp %159 : vector<8x64xf32>
    %cst_30 = arith.constant 1.000000e+00 : f32
    %161 = vector.broadcast %cst_30 : f32 to vector<8x64xf32>
    %162 = arith.addf %161, %160 : vector<8x64xf32>
    %163 = arith.divf %161, %162 : vector<8x64xf32>
    %164 = vector.extract_strided_slice %163 {offsets = [0, 0], sizes = [8, 32], strides = [1, 1]} : vector<8x64xf32> to vector<8x32xf32>
    %165 = vector.extract_strided_slice %163 {offsets = [0, 32], sizes = [8, 32], strides = [1, 1]} : vector<8x64xf32> to vector<8x32xf32>
    %166 = vector.extract_strided_slice %30 {offsets = [40, 0], sizes = [8, 32], strides = [1, 1]} : vector<64x32xf32> to vector<8x32xf32>
    %167 = vector.extract_strided_slice %155 {offsets = [0, 64], sizes = [8, 32], strides = [1, 1]} : vector<8x128xf32> to vector<8x32xf32>
    %168 = arith.mulf %164, %167 : vector<8x32xf32>
    %169 = arith.addf %166, %168 : vector<8x32xf32>
    %170 = math.tanh %169 : vector<8x32xf32>
    %cst_31 = arith.constant 1.000000e+00 : f32
    %171 = vector.broadcast %cst_31 : f32 to vector<8x32xf32>
    %172 = arith.subf %171, %165 : vector<8x32xf32>
    %173 = arith.mulf %172, %170 : vector<8x32xf32>
    %174 = arith.mulf %165, %151 : vector<8x32xf32>
    %175 = arith.addf %173, %174 : vector<8x32xf32>
    %176 = arith.truncf %175 : vector<8x32xf32> to vector<8x32xbf16>
    %cst_32 = arith.constant dense<0.000000e+00> : vector<8x128xf32>
    %177 = tpu.matmul %176, %1, %cst_32 {dimension_numbers = #tpu.dot_dimension_numbers<[1], [0], [0], [1], [0, 0, 1, 1], [], []>} : vector<8x32xbf16>, vector<32x128xbf16>, vector<8x128xf32> -> vector<8x128xf32>
    %178 = vector.broadcast %6 : vector<1x128xf32> to vector<8x128xf32>
    %179 = arith.addf %177, %178 : vector<8x128xf32>
    %180 = vector.extract_strided_slice %29 {offsets = [48, 0], sizes = [8, 64], strides = [1, 1]} : vector<64x64xf32> to vector<8x64xf32>
    %181 = vector.extract_strided_slice %179 {offsets = [0, 0], sizes = [8, 64], strides = [1, 1]} : vector<8x128xf32> to vector<8x64xf32>
    %182 = arith.addf %180, %181 : vector<8x64xf32>
    %183 = arith.negf %182 : vector<8x64xf32>
    %184 = math.exp %183 : vector<8x64xf32>
    %cst_33 = arith.constant 1.000000e+00 : f32
    %185 = vector.broadcast %cst_33 : f32 to vector<8x64xf32>
    %186 = arith.addf %185, %184 : vector<8x64xf32>
    %187 = arith.divf %185, %186 : vector<8x64xf32>
    %188 = vector.extract_strided_slice %187 {offsets = [0, 0], sizes = [8, 32], strides = [1, 1]} : vector<8x64xf32> to vector<8x32xf32>
    %189 = vector.extract_strided_slice %187 {offsets = [0, 32], sizes = [8, 32], strides = [1, 1]} : vector<8x64xf32> to vector<8x32xf32>
    %190 = vector.extract_strided_slice %30 {offsets = [48, 0], sizes = [8, 32], strides = [1, 1]} : vector<64x32xf32> to vector<8x32xf32>
    %191 = vector.extract_strided_slice %179 {offsets = [0, 64], sizes = [8, 32], strides = [1, 1]} : vector<8x128xf32> to vector<8x32xf32>
    %192 = arith.mulf %188, %191 : vector<8x32xf32>
    %193 = arith.addf %190, %192 : vector<8x32xf32>
    %194 = math.tanh %193 : vector<8x32xf32>
    %cst_34 = arith.constant 1.000000e+00 : f32
    %195 = vector.broadcast %cst_34 : f32 to vector<8x32xf32>
    %196 = arith.subf %195, %189 : vector<8x32xf32>
    %197 = arith.mulf %196, %194 : vector<8x32xf32>
    %198 = arith.mulf %189, %175 : vector<8x32xf32>
    %199 = arith.addf %197, %198 : vector<8x32xf32>
    %200 = arith.truncf %199 : vector<8x32xf32> to vector<8x32xbf16>
    %cst_35 = arith.constant dense<0.000000e+00> : vector<8x128xf32>
    %201 = tpu.matmul %200, %1, %cst_35 {dimension_numbers = #tpu.dot_dimension_numbers<[1], [0], [0], [1], [0, 0, 1, 1], [], []>} : vector<8x32xbf16>, vector<32x128xbf16>, vector<8x128xf32> -> vector<8x128xf32>
    %202 = vector.broadcast %6 : vector<1x128xf32> to vector<8x128xf32>
    %203 = arith.addf %201, %202 : vector<8x128xf32>
    %204 = vector.extract_strided_slice %29 {offsets = [56, 0], sizes = [8, 64], strides = [1, 1]} : vector<64x64xf32> to vector<8x64xf32>
    %205 = vector.extract_strided_slice %203 {offsets = [0, 0], sizes = [8, 64], strides = [1, 1]} : vector<8x128xf32> to vector<8x64xf32>
    %206 = arith.addf %204, %205 : vector<8x64xf32>
    %207 = arith.negf %206 : vector<8x64xf32>
    %208 = math.exp %207 : vector<8x64xf32>
    %cst_36 = arith.constant 1.000000e+00 : f32
    %209 = vector.broadcast %cst_36 : f32 to vector<8x64xf32>
    %210 = arith.addf %209, %208 : vector<8x64xf32>
    %211 = arith.divf %209, %210 : vector<8x64xf32>
    %212 = vector.extract_strided_slice %211 {offsets = [0, 0], sizes = [8, 32], strides = [1, 1]} : vector<8x64xf32> to vector<8x32xf32>
    %213 = vector.extract_strided_slice %211 {offsets = [0, 32], sizes = [8, 32], strides = [1, 1]} : vector<8x64xf32> to vector<8x32xf32>
    %214 = vector.extract_strided_slice %30 {offsets = [56, 0], sizes = [8, 32], strides = [1, 1]} : vector<64x32xf32> to vector<8x32xf32>
    %215 = vector.extract_strided_slice %203 {offsets = [0, 64], sizes = [8, 32], strides = [1, 1]} : vector<8x128xf32> to vector<8x32xf32>
    %216 = arith.mulf %212, %215 : vector<8x32xf32>
    %217 = arith.addf %214, %216 : vector<8x32xf32>
    %218 = math.tanh %217 : vector<8x32xf32>
    %cst_37 = arith.constant 1.000000e+00 : f32
    %219 = vector.broadcast %cst_37 : f32 to vector<8x32xf32>
    %220 = arith.subf %219, %213 : vector<8x32xf32>
    %221 = arith.mulf %220, %218 : vector<8x32xf32>
    %222 = arith.mulf %213, %199 : vector<8x32xf32>
    %223 = arith.addf %221, %222 : vector<8x32xf32>
    %224 = tpu.concatenate %55, %79, %103, %127, %151, %175, %199, %223 in 0 : vector<8x32xf32>, vector<8x32xf32>, vector<8x32xf32>, vector<8x32xf32>, vector<8x32xf32>, vector<8x32xf32>, vector<8x32xf32>, vector<8x32xf32> -> vector<64x32xf32>
    %225 = arith.truncf %224 : vector<64x32xf32> to vector<64x32xbf16>
    %cst_38 = arith.constant dense<0.000000e+00> : vector<64x128xf32>
    %226 = tpu.matmul %225, %2, %cst_38 {dimension_numbers = #tpu.dot_dimension_numbers<[1], [0], [0], [1], [0, 0, 1, 1], [], []>} : vector<64x32xbf16>, vector<32x128xbf16>, vector<64x128xf32> -> vector<64x128xf32>
    %227 = arith.addf %226, %28 : vector<64x128xf32>
    %228 = math.tanh %227 : vector<64x128xf32>
    %229 = arith.truncf %228 : vector<64x128xf32> to vector<64x128xbf16>
    %cst_39 = arith.constant dense<0.000000e+00> : vector<64x128xf32>
    %230 = tpu.matmul %229, %4, %cst_39 {dimension_numbers = #tpu.dot_dimension_numbers<[1], [0], [0], [1], [0, 0, 1, 1], [], []>} : vector<64x128xbf16>, vector<128x128xbf16>, vector<64x128xf32> -> vector<64x128xf32>
    %231 = vector.broadcast %8 : vector<1x128xf32> to vector<64x128xf32>
    %232 = arith.addf %230, %231 : vector<64x128xf32>
    %cst_40 = arith.constant dense<0xFF800000> : vector<64xf32>
    %233 = vector.multi_reduction <maximumf>, %232, %cst_40 [1] : vector<64x128xf32> to vector<64xf32>
    %234 = vector.shape_cast %233 : vector<64xf32> to vector<64x1xf32>
    %235 = vector.broadcast %234 : vector<64x1xf32> to vector<64x128xf32>
    %236 = arith.subf %232, %235 : vector<64x128xf32>
    %237 = math.exp %236 : vector<64x128xf32>
    %cst_41 = arith.constant dense<0.000000e+00> : vector<64xf32>
    %238 = vector.multi_reduction <add>, %237, %cst_41 [1] : vector<64x128xf32> to vector<64xf32>
    %239 = vector.shape_cast %238 : vector<64xf32> to vector<64x1xf32>
    %240 = math.log %239 : vector<64x1xf32>
    %241 = arith.addf %234, %240 : vector<64x1xf32>
    %242 = vector.broadcast %241 : vector<64x1xf32> to vector<64x128xf32>
    %243 = arith.subf %232, %242 : vector<64x128xf32>
    %c0_42 = arith.constant 0 : index
    %c0_43 = arith.constant 0 : index
    %244 = vector.load %arg3[%c0_42, %c0_43] : memref<64x128xf32, #tpu.memory_space<vmem>>, vector<64x128xf32>
    tpu.vector_store %arg3[%c0_42, %c0_43], %243 {strides = array<i32>} : memref<64x128xf32, #tpu.memory_space<vmem>>, vector<64x128xf32>,
    return
  }
}

</mosaic_0001>

<bundles_post_ra>
// kernel: tpu_custom_call.1
= control target key start
LH: loop header
LB: loop body
LE: loop exit
PB: predicated region body
PF: predicated region fallthrough
CT: control target
= control target key end

     0   :  { %8 = vsyncpa [#allocation3], 0  ;;  %s2118_s0 = inlined_call_operand.vmem [shape: s32[64,2], index: 0, kind: input, shape index: {}]   ;;  %s2119_s1 = inlined_call_operand.hbm [shape: bf16[256,128], index: 1, kind: input, shape index: {}]   ;;  %s2120_s2 = inlined_call_operand.vmem [shape: f32[4,128], index: 2, kind: input, shape index: {}]   ;;  %s2121_s3 = inlined_call_operand.hbm [shape: f32[64,128], index: 3, kind: output, shape index: {}]  }
   0x1   :  { %9 = vsyncpa [#allocation4], 0  ;;  %s1742_s12 = smov [#allocation2]   ;;  %s1694_s16 = scalar_lea.hbm %s2119_s1, 2048 }
   0x2   :  { %s17_s13 = sshll.u32 %s1742_s12, 4  ;;  %p1695_p0 = scmp.ne.s32.totalorder %s2119_s1, %s1694_s16  ;;  %s18_s13 = int_to_ptr.vmem [resolvable:$true] %s17_s13 }
   0x3   :  { %p1698_p1 = scmp.lt.u32.totalorder %s1694_s16, %s2119_s1 }
   0x5   :  { %p1700_p2 = pnand %p1698_p1, %p1695_p0 }
   0x7   :  { %1703 = shalt.err (!%p1700_p2)
}
   0x8   :  { %s1704_s21 = scalar_lea.vmem %s18_s13, 2048  ;;  %p1709_p4 = scmp.lt.s32.totalorder %s18_s13, %s18_s13 }
   0x9   :  { %p1705_p3 = scmp.ne.s32.totalorder %s18_s13, %s1704_s21  ;;  %p1710_p5 = scmp.lt.s32.totalorder %s1704_s21, %s1704_s21 }
   0xb   :  { %p1711_p6 = por %p1710_p5, %p1709_p4 }
   0xd   :  { %p1712_p7 = pnand %p1711_p6, %p1705_p3 }
   0xf   :  { %1715 = shalt.err (!%p1712_p7)
}
  0x10   :  { %s1743_s22 = smov 64   ;;  %s1744_s23 = smov 4  }
  0x11   :  { %23 = dma.hbm_to_vmem [thread:$0]  %s2119_s1, 2048, %s18_s13, [#allocation3], %s1743_s22, %s1743_s22, %s1744_s23  }
  0x12   :  { %1738 = dma.done.wait [#allocation3], 2048  }
  0x13   :  { %1739 = vsyncadd [#allocation3], 4294965248  ;;  %v1745_v0 = vmov 0   ;;  %v1746_v1 = vmov 0.0   ;;  %vm1747_vm0 = vmmov 0   ;;  %v1793_v2 = vld [vmem:[%s2118_s0 + $0x10] sm:$0xff]  ;;  %v74_v10 = vlaneseq }
  0x14   :  { %1579 = vset.pattern.permute.xlu1 %v1745_v0  ;;  %1578 = vset.pattern.permute.xlu0 %v1745_v0  ;;  %v1798_v3 = vld [vmem:[%s2118_s0] sm:$0xff]  ;;  %v1803_v4 = vld [vmem:[%s2118_s0 + $0x18] sm:$0xff]  ;;  %v1810_v5 = vld [vmem:[%s2118_s0 + $0x8] sm:$0xff]  ;;  %vm196_vm5 = vcmask 261120   ;;  %v1748_v43 = vmov 1   ;;  %s1749_s18 = smov 96  }
  0x15   :  { %1451 = vmatprep.subr.bf16.mxu0 %v1746_v1  ;;  %1455 = vmatprep.mubr.msk.bf16.mxu0 %vm1747_vm0, %v1746_v1  ;;  %v1812_v6 = vld [vmem:[#allocation2 + $0x10] sm:$0xff]   ;;  %v1814_v7 = vld [vmem:[#allocation2 + $0x18] sm:$0xff]   ;;  %v1584_v8 = vld [vmem:[#allocation2] sm:$0xff]   ;;  %v1828_v11 = vand.u32 127, %v74_v10 }
  0x16   :  { %83 = vperm.xlu1 %1579, %v1793_v2   ;;  %77 = vperm.xlu0 %1578, %v1798_v3   ;;  %v1585_v9 = vld [vmem:[#allocation2 + $0x8] sm:$0xff]   ;;  %v1843_v22 = vld [vmem:[%s2120_s2 + $0x1] ss:$0 sm:$0xff]  ;;  %v1850_v28 = vld [vmem:[%s2120_s2] ss:$0 sm:$0xff] }
  0x17   :  { %1452 = vmatpush3.bf16.msra.mxu0 %v1812_v6  ;;  %1427 = vmatprep.subr.bf16.mxu1 %v1584_v8  ;;  %v70_v41 = vld [vmem:[%s2118_s0 + $0x20] sm:$0xff]  ;;  %v72_v42 = vld [vmem:[%s2118_s0 + $0x30] sm:$0xff]  ;;  %v71_v44 = vld [vmem:[%s2118_s0 + $0x28] sm:$0xff] }
  0x18   :  { %1453 = vmatprep.subr.bf16.mxu0 %v1746_v1  ;;  %1428 = vmatpush3.bf16.msra.mxu1 %v1584_v8  ;;  %v73_v45 = vld [vmem:[%s2118_s0 + $0x38] sm:$0xff]  ;;  %v1587_v50 = vld [vmem:[#allocation2 + $0x38] sm:$0xff]  }
  0x19   :  { %1429 = vmatprep.subr.bf16.mxu1 %v1585_v9  ;;  %v1586_v49 = vld [vmem:[#allocation2 + $0x30] sm:$0xff]  }
  0x1a   :  { %86 = vperm.xlu1 %1579, %v1803_v4   ;;  %80 = vperm.xlu0 %1578, %v1810_v5  }
  0x1b   :  { %1454 = vmatpush3.bf16.msra.mxu0 %v1814_v7 }
  0x1c   :  { %1467 = vmatprep.subr.bf16.mxu0 %v1746_v1  ;;  %1430 = vmatpush3.bf16.msra.mxu1 %v1585_v9 }
  0x1d   :  { %1439 = vmatprep.subr.bf16.mxu1 %v1586_v49 }
  0x1e   :  { %1456 = vmatmul.mubr.bf16.vlgmr.msra.gmra.mrb[0].mxu0 %v1745_v0 }
  0x1f   :  { %1468 = vmatpush3.bf16.msra.mxu0 %v1812_v6  ;;  %1471 = vmatprep.mubr.msk.bf16.mxu0 %vm1747_vm0, %v1746_v1 }
  0x20   :  { %1469 = vmatprep.subr.bf16.mxu0 %v1746_v1 }
  0x23   :  { %1470 = vmatpush3.bf16.msra.mxu0 %v1814_v7 }
  0x24   :  { %1483 = vmatprep.subr.bf16.mxu0 %v1746_v1 }
  0x95   :  { %v84_v12 = vpop.permute.xlu1 %83  ;;  %v78_v13 = vpop.permute.xlu0 %77 }
  0x96   :  { %vm102_vm1 = vcmp.eq.s32.totalorder %v1828_v11, %v84_v12  ;;  %vm100_vm2 = vcmp.eq.s32.totalorder %v1828_v11, %v78_v13 }
  0x97   :  { %v1312_v16 = vsel %vm102_vm1, 1.0, %v1746_v1  ;;  %v1310_v17 = vsel %vm100_vm2, 1.0, %v1746_v1 }
  0x99   :  { %v87_v14 = vpop.permute.xlu1 %86  ;;  %v81_v15 = vpop.permute.xlu0 %80 }
  0x9a   :  { %vm103_vm3 = vcmp.eq.s32.totalorder %v1828_v11, %v87_v14  ;;  %vm101_vm4 = vcmp.eq.s32.totalorder %v1828_v11, %v81_v15 }
  0x9b   :  { %v1313_v18 = vsel %vm103_vm3, 1.0, %v1746_v1  ;;  %v1311_v19 = vsel %vm101_vm4, 1.0, %v1746_v1 }
  0x9c   :  { %v125_v20 = vpack.c.bf16 %v1313_v18, %v1312_v16  ;;  %v124_v21 = vpack.c.bf16 %v1311_v19, %v1310_v17 }
  0x9e   :  { %1431 = vmatprep.mubr.msk.bf16.mxu1 %vm196_vm5, %v124_v21 }
  0x9f   :  { %1432 = vmatmul.mubr.msk.bf16.vlgmr.msra.gmra.mrb[0].mxu1 %vm196_vm5, %v125_v20 }
  0xa0   :  { %1440 = vmatpush3.bf16.msra.mxu1 %v1586_v49 }
  0xa1   :  { %1441 = vmatprep.subr.bf16.mxu1 %v1587_v50 }
  0xa4   :  { %1442 = vmatpush3.bf16.msra.mxu1 %v1587_v50 }
  0xa5   :  { %1459 = vmatprep.subr.bf16.mxu1 %v1746_v1 }
  0xf1   :  { %v420_v23 = vpop.f32.mrb[0].mxu0 }
  0xf2   :  { %v421_v24 = vadd.f32 %v1843_v22, %v420_v23  ;;  %v1457_v25 = vpop.f32.mrb[1].mxu0 }
  0xf3   :  { %v423_v26 = vpop.f32.mrb[2].mxu0 }
  0xf4   :  { %v1458_v27 = vpop.f32.mrb[3].mxu0  ;;  %434 = vrot.lane.b32.xlu0 %v421_v24, %s1743_s22 }
 0x166   :  { %v435_v38 = vpop.permute.xlu0 %434 }
 0x172   :  { %v1852_v29 = vpop.f32.mrb[0].mxu1 }
 0x173   :  { %v243_v30 = vpop.f32.mrb[1].mxu1 }
 0x174   :  { %v244_v31 = vadd.f32 %v1850_v28, %v243_v30  ;;  %v1855_v32 = vpop.f32.mrb[2].mxu1 }
 0x175   :  { %v1857_v33 = vpop.f32.mrb[3].mxu1 }
 0x176   :  { %v426_v34 = vadd.f32 %v421_v24, %v244_v31 }
 0x178   :  { %v1343_v35 = vmul.f32 -1.442695, %v426_v34 }
 0x17a   :  { %1598 = vpow2.f32 %v1343_v35 }
 0x184   :  { %v1599_v36 = vpop.eup %1598 }
 0x185   :  { %v430_v37 = vadd.f32 1.0, %v1599_v36 }
 0x187   :  { %1600 = vrcp.f32 %v430_v37 }
 0x191   :  { %v1601_v39 = vpop.eup %1600 }
 0x192   :  { %v437_v40 = vmul.f32 %v1601_v39, %v435_v38  ;;  %v444_v52 = vsub.f32 1.0, %v1601_v39  ;;  %v450_v55 = vmul.f32 0.0, %v1601_v39 }
 0x194   :  { %439 = vrot.lane.b32.xlu1 %v437_v40, %s1743_s22 }
 0x198   :  { %89 = vperm.xlu1 %1579, %v70_v41  }
 0x19c   :  { %95 = vperm.xlu1 %1579, %v72_v42  }
 0x1a0   :  { %1580 = vset.pattern.permute.xlu1 %v1748_v43 }
 0x1a1   :  { %129 = vperm.xlu1 %1580, %v1798_v3  }
 0x1a5   :  { %135 = vperm.xlu1 %1580, %v1793_v2  }
 0x1a9   :  { %138 = vperm.xlu1 %1580, %v1803_v4  }
 0x1ad   :  { %144 = vperm.xlu1 %1580, %v71_v44  }
 0x1b1   :  { %150 = vperm.xlu1 %1580, %v73_v45  }
 0x206   :  { %v440_v46 = vpop.permute.xlu1 %439 }
 0x207   :  { %v442_v47 = vadd.f32 %v440_v46, %v244_v31 }
 0x209   :  { %1602 = vtanh.f32 %v442_v47 }
 0x213   :  { %v1603_v48 = vpop.eup %1602 }
 0x214   :  { %446 = vrot.lane.b32.xlu0 %v1603_v48, %s1749_s18 }
 0x217   :  { %v90_v51 = vpop.permute.xlu1 %89 }
 0x218   :  { %92 = vperm.xlu0 %1578, %v71_v44   ;;  %vm104_vm6 = vcmp.eq.s32.totalorder %v1828_v11, %v90_v51 }
 0x219   :  { %v1314_v63 = vsel %vm104_vm6, 1.0, %v1746_v1 }
 0x21b   :  { %v96_v54 = vpop.permute.xlu1 %95 }
 0x21c   :  { %98 = vperm.xlu0 %1578, %v73_v45   ;;  %vm106_vm8 = vcmp.eq.s32.totalorder %v1828_v11, %v96_v54 }
 0x21d   :  { %v1316_v4 = vsel %vm106_vm8, 1.0, %v1746_v1 }
 0x220   :  { %1581 = vset.pattern.permute.xlu0 %v1748_v43  ;;  %v130_v59 = vpop.permute.xlu1 %129 }
 0x221   :  { %132 = vperm.xlu0 %1581, %v1810_v5   ;;  %vm152_vm10 = vcmp.eq.s32.totalorder %v1828_v11, %v130_v59 }
 0x222   :  { %v1318_v10 = vsel %vm152_vm10, 1.0, %v1746_v1 }
 0x224   :  { %v136_v60 = vpop.permute.xlu1 %135 }
 0x225   :  { %141 = vperm.xlu0 %1581, %v70_v41   ;;  %vm154_vm11 = vcmp.eq.s32.totalorder %v1828_v11, %v136_v60  ;;  %v247_v41 = vadd.f32 %v1850_v28, %v1857_v33 }
 0x226   :  { %v1320_v13 = vsel %vm154_vm11, 1.0, %v1746_v1 }
 0x228   :  { %v139_v62 = vpop.permute.xlu1 %138 }
 0x229   :  { %147 = vperm.xlu0 %1581, %v72_v42   ;;  %vm155_vm12 = vcmp.eq.s32.totalorder %v1828_v11, %v139_v62 }
 0x22a   :  { %v1321_v14 = vsel %vm155_vm12, 1.0, %v1746_v1 }
 0x22b   :  { %v177_v18 = vpack.c.bf16 %v1321_v14, %v1320_v13 }
 0x22c   :  { %v145_v8 = vpop.permute.xlu1 %144 }
 0x22d   :  { %vm157_vm14 = vcmp.eq.s32.totalorder %v1828_v11, %v145_v8 }
 0x22e   :  { %v1323_v20 = vsel %vm157_vm14, 1.0, %v1746_v1 }
 0x230   :  { %v151_v17 = vpop.permute.xlu1 %150 }
 0x231   :  { %vm159_vm1 = vcmp.eq.s32.totalorder %v1828_v11, %v151_v17 }
 0x232   :  { %v1325_v25 = vsel %vm159_vm1, 1.0, %v1746_v1 }
 0x286   :  { %v447_v53 = vpop.permute.xlu0 %446 }
 0x287   :  { %v449_v56 = vmul.f32 %v447_v53, %v444_v52 }
 0x289   :  { %v1878_v57 = vadd.f32 %v450_v55, %v449_v56 }
 0x28b   :  { %v452_v58 = vpack.c.bf16 %v1878_v57, %v1878_v57 }
 0x28d   :  { %454 = vrot.lane.b32.xlu0 %v452_v58, %s1749_s18 }
 0x297   :  { %v93_v61 = vpop.permute.xlu0 %92 }
 0x298   :  { %vm105_vm7 = vcmp.eq.s32.totalorder %v1828_v11, %v93_v61 }
 0x299   :  { %v1315_v0 = vsel %vm105_vm7, 1.0, %v1746_v1 }
 0x29a   :  { %v126_v2 = vpack.c.bf16 %v1315_v0, %v1314_v63  ;;  %v252_v0 = vadd.f32 %v1852_v29, %v1850_v28 }
 0x29b   :  { %v99_v3 = vpop.permute.xlu0 %98 }
 0x29c   :  { %vm107_vm9 = vcmp.eq.s32.totalorder %v1828_v11, %v99_v3  ;;  %1435 = vmatprep.mubr.msk.bf16.mxu1 %vm196_vm5, %v126_v2 }
 0x29d   :  { %v1317_v5 = vsel %vm107_vm9, 1.0, %v1746_v1 }
 0x29e   :  { %v127_v9 = vpack.c.bf16 %v1317_v5, %v1316_v4 }
 0x2a0   :  { %1436 = vmatmul.mubr.msk.bf16.gmra.mrb[4].mxu1 %vm196_vm5, %v127_v9  ;;  %v133_v12 = vpop.permute.xlu0 %132 }
 0x2a1   :  { %vm153_vm13 = vcmp.eq.s32.totalorder %v1828_v11, %v133_v12 }
 0x2a2   :  { %v1319_v15 = vsel %vm153_vm13, 1.0, %v1746_v1 }
 0x2a3   :  { %v176_v16 = vpack.c.bf16 %v1319_v15, %v1318_v10 }
 0x2a4   :  { %v142_v19 = vpop.permute.xlu0 %141 }
 0x2a5   :  { %vm156_vm15 = vcmp.eq.s32.totalorder %v1828_v11, %v142_v19  ;;  %1443 = vmatprep.mubr.msk.bf16.mxu1 %vm196_vm5, %v176_v16 }
 0x2a6   :  { %v1322_v21 = vsel %vm156_vm15, 1.0, %v1746_v1 }
 0x2a7   :  { %v178_v23 = vpack.c.bf16 %v1323_v20, %v1322_v21 }
 0x2a8   :  { %1444 = vmatmul.mubr.msk.bf16.vlgmr.msra.gmra.mrb[8].mxu1 %vm196_vm5, %v177_v18  ;;  %v148_v24 = vpop.permute.xlu0 %147 }
 0x2a9   :  { %vm158_vm2 = vcmp.eq.s32.totalorder %v1828_v11, %v148_v24  ;;  %1447 = vmatprep.mubr.msk.bf16.mxu1 %vm196_vm5, %v178_v23  ;;  %1460 = vmatpush3.bf16.msra.mxu1 %v1812_v6 }
 0x2aa   :  { %v1324_v26 = vsel %vm158_vm2, 1.0, %v1746_v1  ;;  %1461 = vmatprep.subr.bf16.mxu1 %v1746_v1 }
 0x2ab   :  { %v179_v27 = vpack.c.bf16 %v1325_v25, %v1324_v26 }
 0x2ad   :  { %1462 = vmatpush3.bf16.msra.mxu1 %v1814_v7 }
 0x2ae   :  { %1475 = vmatprep.subr.bf16.mxu1 %v1746_v1 }
 0x2b0   :  { %1448 = vmatmul.mubr.msk.bf16.gmra.mrb[12].mxu1 %vm196_vm5, %v179_v27  ;;  %v255_v27 = vadd.f32 %v1855_v32, %v1850_v28 }
 0x2b1   :  { %1463 = vmatprep.mubr.msk.bf16.mxu1 %vm1747_vm0, %v1746_v1 }
 0x2ff   :  { %v455_v11 = vpop.permute.xlu0 %454 }
 0x300   :  { %1464 = vmatmul.mubr.msk.bf16.vlgmr.msra.gmra.mrb[16].mxu1 %vm196_vm5, %v455_v11 }
 0x301   :  { %1476 = vmatpush3.bf16.msra.mxu1 %v1812_v6  ;;  %1479 = vmatprep.mubr.msk.bf16.mxu1 %vm1747_vm0, %v1746_v1 }
 0x302   :  { %1477 = vmatprep.subr.bf16.mxu1 %v1746_v1 }
 0x305   :  { %1478 = vmatpush3.bf16.msra.mxu1 %v1814_v7 }
 0x306   :  { %1491 = vmatprep.subr.bf16.mxu1 %v1746_v1 }
 0x373   :  { %v1926_v30 = vpop.f32.mrb[4].mxu1 }
 0x374   :  { %v1928_v31 = vpop.f32.mrb[5].mxu1 }
 0x375   :  { %v1930_v34 = vpop.f32.mrb[6].mxu1 }
 0x376   :  { %v1932_v35 = vpop.f32.mrb[7].mxu1 }
 0x3d3   :  { %v493_v36 = vpop.f32.mrb[16].mxu1 }
 0x3d4   :  { %v494_v37 = vadd.f32 %v1843_v22, %v493_v36  ;;  %v1465_v38 = vpop.f32.mrb[17].mxu1 }
 0x3d5   :  { %v496_v39 = vpop.f32.mrb[18].mxu1 }
 0x3d6   :  { %507 = vrot.lane.b32.xlu1 %v494_v37, %s1743_s22  ;;  %v1466_v40 = vpop.f32.mrb[19].mxu1  ;;  %v499_v42 = vadd.f32 %v494_v37, %v247_v41 }
 0x3d8   :  { %v1345_v43 = vmul.f32 -1.442695, %v499_v42 }
 0x3da   :  { %1604 = vpow2.f32 %v1345_v43 }
 0x3e4   :  { %v1605_v44 = vpop.eup %1604 }
 0x3e5   :  { %v503_v45 = vadd.f32 1.0, %v1605_v44 }
 0x3e7   :  { %1606 = vrcp.f32 %v503_v45 }
 0x3f1   :  { %v1607_v46 = vpop.eup %1606 }
 0x3f2   :  { %v517_v52 = vsub.f32 1.0, %v1607_v46  ;;  %v523_v33 = vmul.f32 %v1607_v46, %v1878_v57 }
 0x448   :  { %v508_v47 = vpop.permute.xlu1 %507 }
 0x449   :  { %v510_v48 = vmul.f32 %v1607_v46, %v508_v47 }
 0x44b   :  { %512 = vrot.lane.b32.xlu0 %v510_v48, %s1743_s22 }
 0x4bd   :  { %v513_v49 = vpop.permute.xlu0 %512 }
 0x4be   :  { %v515_v50 = vadd.f32 %v513_v49, %v247_v41 }
 0x4c0   :  { %1608 = vtanh.f32 %v515_v50 }
 0x4ca   :  { %v1609_v51 = vpop.eup %1608 }
 0x4cb   :  { %519 = vrot.lane.b32.xlu1 %v1609_v51, %s1749_s18 }
 0x53d   :  { %v520_v53 = vpop.permute.xlu1 %519 }
 0x53e   :  { %v522_v54 = vmul.f32 %v520_v53, %v517_v52 }
 0x540   :  { %v1941_v55 = vadd.f32 %v523_v33, %v522_v54 }
 0x542   :  { %v525_v56 = vpack.c.bf16 %v1941_v55, %v1941_v55 }
 0x544   :  { %527 = vrot.lane.b32.xlu0 %v525_v56, %s1749_s18  ;;  %v260_v56 = vadd.f32 %v1850_v28, %v1928_v31 }
 0x5b6   :  { %v528_v58 = vpop.permute.xlu0 %527 }
 0x5b7   :  { %1472 = vmatmul.mubr.msk.bf16.vlgmr.msra.gmra.mrb[4].mxu0 %vm196_vm5, %v528_v58 }
 0x5b8   :  { %1484 = vmatpush3.bf16.msra.mxu0 %v1812_v6  ;;  %1487 = vmatprep.mubr.msk.bf16.mxu0 %vm1747_vm0, %v1746_v1 }
 0x5b9   :  { %1485 = vmatprep.subr.bf16.mxu0 %v1746_v1 }
 0x5bc   :  { %1486 = vmatpush3.bf16.msra.mxu0 %v1814_v7 }
 0x5bd   :  { %1499 = vmatprep.subr.bf16.mxu0 %v1746_v1 }
 0x68a   :  { %v566_v59 = vpop.f32.mrb[4].mxu0 }
 0x68b   :  { %v567_v60 = vadd.f32 %v1843_v22, %v566_v59  ;;  %v1473_v61 = vpop.f32.mrb[5].mxu0 }
 0x68c   :  { %v569_v62 = vpop.f32.mrb[6].mxu0 }
 0x68d   :  { %580 = vrot.lane.b32.xlu1 %v567_v60, %s1743_s22  ;;  %v1474_v63 = vpop.f32.mrb[7].mxu0  ;;  %v572_v2 = vadd.f32 %v567_v60, %v252_v0 }
 0x68f   :  { %v1347_v3 = vmul.f32 -1.442695, %v572_v2 }
 0x691   :  { %1610 = vpow2.f32 %v1347_v3 }
 0x69b   :  { %v1611_v4 = vpop.eup %1610 }
 0x69c   :  { %v576_v5 = vadd.f32 1.0, %v1611_v4 }
 0x69e   :  { %1612 = vrcp.f32 %v576_v5 }
 0x6a8   :  { %v1613_v8 = vpop.eup %1612 }
 0x6a9   :  { %v590_v15 = vsub.f32 1.0, %v1613_v8  ;;  %v596_v29 = vmul.f32 %v1613_v8, %v1941_v55 }
 0x6ff   :  { %v581_v9 = vpop.permute.xlu1 %580 }
 0x700   :  { %v583_v10 = vmul.f32 %v1613_v8, %v581_v9 }
 0x702   :  { %585 = vrot.lane.b32.xlu0 %v583_v10, %s1743_s22 }
 0x774   :  { %v586_v12 = vpop.permute.xlu0 %585 }
 0x775   :  { %v588_v13 = vadd.f32 %v586_v12, %v252_v0 }
 0x777   :  { %1614 = vtanh.f32 %v588_v13 }
 0x781   :  { %v1615_v14 = vpop.eup %1614 }
 0x782   :  { %592 = vrot.lane.b32.xlu1 %v1615_v14, %s1749_s18 }
 0x7f4   :  { %v593_v16 = vpop.permute.xlu1 %592 }
 0x7f5   :  { %v595_v17 = vmul.f32 %v593_v16, %v590_v15 }
 0x7f7   :  { %v1960_v18 = vadd.f32 %v596_v29, %v595_v17 }
 0x7f9   :  { %v598_v19 = vpack.c.bf16 %v1960_v18, %v1960_v18 }
 0x7fb   :  { %600 = vrot.lane.b32.xlu0 %v598_v19, %s1749_s18  ;;  %v263_v19 = vadd.f32 %v1850_v28, %v1932_v35 }
 0x86d   :  { %v601_v20 = vpop.permute.xlu0 %600 }
 0x86e   :  { %1480 = vmatmul.mubr.msk.bf16.vlgmr.msra.gmra.mrb[20].mxu1 %vm196_vm5, %v601_v20 }
 0x86f   :  { %1492 = vmatpush3.bf16.msra.mxu1 %v1812_v6  ;;  %1495 = vmatprep.mubr.msk.bf16.mxu1 %vm1747_vm0, %v1746_v1 }
 0x870   :  { %1493 = vmatprep.subr.bf16.mxu1 %v1746_v1 }
 0x873   :  { %1494 = vmatpush3.bf16.msra.mxu1 %v1814_v7 }
 0x874   :  { %1507 = vmatprep.subr.bf16.mxu1 %v1746_v1 }
 0x941   :  { %v639_v21 = vpop.f32.mrb[20].mxu1 }
 0x942   :  { %v640_v23 = vadd.f32 %v1843_v22, %v639_v21  ;;  %v1481_v24 = vpop.f32.mrb[21].mxu1 }
 0x943   :  { %v642_v25 = vpop.f32.mrb[22].mxu1 }
 0x944   :  { %653 = vrot.lane.b32.xlu1 %v640_v23, %s1743_s22  ;;  %v1482_v26 = vpop.f32.mrb[23].mxu1  ;;  %v645_v11 = vadd.f32 %v640_v23, %v255_v27 }
 0x946   :  { %v1349_v36 = vmul.f32 -1.442695, %v645_v11 }
 0x948   :  { %1616 = vpow2.f32 %v1349_v36 }
 0x952   :  { %v1617_v37 = vpop.eup %1616 }
 0x953   :  { %v649_v38 = vadd.f32 1.0, %v1617_v37 }
 0x955   :  { %1618 = vrcp.f32 %v649_v38 }
 0x95f   :  { %v1619_v39 = vpop.eup %1618 }
 0x960   :  { %v663_v45 = vsub.f32 1.0, %v1619_v39  ;;  %v669_v32 = vmul.f32 %v1619_v39, %v1960_v18 }
 0x9b6   :  { %v654_v40 = vpop.permute.xlu1 %653 }
 0x9b7   :  { %v656_v41 = vmul.f32 %v1619_v39, %v654_v40 }
 0x9b9   :  { %658 = vrot.lane.b32.xlu0 %v656_v41, %s1743_s22 }
 0xa2b   :  { %v659_v42 = vpop.permute.xlu0 %658 }
 0xa2c   :  { %v661_v43 = vadd.f32 %v659_v42, %v255_v27 }
 0xa2e   :  { %1620 = vtanh.f32 %v661_v43 }
 0xa38   :  { %v1621_v44 = vpop.eup %1620 }
 0xa39   :  { %665 = vrot.lane.b32.xlu1 %v1621_v44, %s1749_s18 }
 0xaab   :  { %v666_v46 = vpop.permute.xlu1 %665 }
 0xaac   :  { %v668_v47 = vmul.f32 %v666_v46, %v663_v45  ;;  %v268_v46 = vadd.f32 %v1926_v30, %v1850_v28 }
 0xaae   :  { %v1979_v48 = vadd.f32 %v669_v32, %v668_v47 }
 0xab0   :  { %v671_v49 = vpack.c.bf16 %v1979_v48, %v1979_v48 }
 0xab2   :  { %673 = vrot.lane.b32.xlu0 %v671_v49, %s1749_s18 }
 0xb24   :  { %v674_v50 = vpop.permute.xlu0 %673 }
 0xb25   :  { %1488 = vmatmul.mubr.msk.bf16.vlgmr.msra.gmra.mrb[8].mxu0 %vm196_vm5, %v674_v50 }
 0xb26   :  { %1500 = vmatpush3.bf16.msra.mxu0 %v1812_v6  ;;  %1503 = vmatprep.mubr.msk.bf16.mxu0 %vm1747_vm0, %v1746_v1 }
 0xb27   :  { %1501 = vmatprep.subr.bf16.mxu0 %v1746_v1 }
 0xb2a   :  { %1502 = vmatpush3.bf16.msra.mxu0 %v1814_v7 }
 0xbf8   :  { %v712_v51 = vpop.f32.mrb[8].mxu0 }
 0xbf9   :  { %v713_v52 = vadd.f32 %v1843_v22, %v712_v51  ;;  %v1489_v53 = vpop.f32.mrb[9].mxu0 }
 0xbfa   :  { %v715_v33 = vpop.f32.mrb[10].mxu0 }
 0xbfb   :  { %726 = vrot.lane.b32.xlu1 %v713_v52, %s1743_s22  ;;  %v1490_v54 = vpop.f32.mrb[11].mxu0  ;;  %v718_v58 = vadd.f32 %v713_v52, %v260_v56 }
 0xbfd   :  { %v1351_v59 = vmul.f32 -1.442695, %v718_v58 }
 0xbff   :  { %1622 = vpow2.f32 %v1351_v59 }
 0xc09   :  { %v1623_v60 = vpop.eup %1622 }
 0xc0a   :  { %v722_v61 = vadd.f32 1.0, %v1623_v60 }
 0xc0c   :  { %1624 = vrcp.f32 %v722_v61 }
 0xc16   :  { %v1625_v62 = vpop.eup %1624 }
 0xc17   :  { %v736_v5 = vsub.f32 1.0, %v1625_v62  ;;  %v742_v31 = vmul.f32 %v1625_v62, %v1979_v48 }
 0xc6d   :  { %v727_v63 = vpop.permute.xlu1 %726 }
 0xc6e   :  { %v729_v0 = vmul.f32 %v1625_v62, %v727_v63 }
 0xc70   :  { %731 = vrot.lane.b32.xlu0 %v729_v0, %s1743_s22 }
 0xce2   :  { %v732_v2 = vpop.permute.xlu0 %731 }
 0xce3   :  { %v734_v3 = vadd.f32 %v732_v2, %v260_v56 }
 0xce5   :  { %1626 = vtanh.f32 %v734_v3 }
 0xcef   :  { %v1627_v4 = vpop.eup %1626 }
 0xcf0   :  { %738 = vrot.lane.b32.xlu1 %v1627_v4, %s1749_s18 }
 0xd62   :  { %v739_v8 = vpop.permute.xlu1 %738 }
 0xd63   :  { %v741_v9 = vmul.f32 %v739_v8, %v736_v5  ;;  %v271_v8 = vadd.f32 %v1930_v34, %v1850_v28  ;;  %v1589_v28 = vld [vmem:[#allocation2 + $0x28] sm:$0xff]  }
 0xd65   :  { %v1997_v10 = vadd.f32 %v742_v31, %v741_v9 }
 0xd67   :  { %v744_v12 = vpack.c.bf16 %v1997_v10, %v1997_v10 }
 0xd69   :  { %746 = vrot.lane.b32.xlu0 %v744_v12, %s1749_s18 }
 0xddb   :  { %v747_v13 = vpop.permute.xlu0 %746 }
 0xddc   :  { %1496 = vmatmul.mubr.msk.bf16.vlgmr.msra.gmra.mrb[24].mxu1 %vm196_vm5, %v747_v13 }
 0xddd   :  { %1508 = vmatpush3.bf16.msra.mxu1 %v1812_v6  ;;  %1511 = vmatprep.mubr.msk.bf16.mxu1 %vm1747_vm0, %v1746_v1 }
 0xdde   :  { %1509 = vmatprep.subr.bf16.mxu1 %v1746_v1 }
 0xde1   :  { %1510 = vmatpush3.bf16.msra.mxu1 %v1814_v7 }
 0xeaf   :  { %v785_v14 = vpop.f32.mrb[24].mxu1 }
 0xeb0   :  { %v786_v15 = vadd.f32 %v1843_v22, %v785_v14  ;;  %v1497_v16 = vpop.f32.mrb[25].mxu1 }
 0xeb1   :  { %v788_v29 = vpop.f32.mrb[26].mxu1 }
 0xeb2   :  { %799 = vrot.lane.b32.xlu1 %v786_v15, %s1743_s22  ;;  %v1498_v17 = vpop.f32.mrb[27].mxu1  ;;  %v791_v20 = vadd.f32 %v786_v15, %v263_v19  ;;  %v1588_v29 = vld [vmem:[#allocation2 + $0x20] sm:$0xff]  }
 0xeb3   :  { %1515 = vmatprep.subr.bf16.mxu1 %v1588_v29 }
 0xeb4   :  { %v1353_v6 = vmul.f32 -1.442695, %v791_v20 }
 0xeb6   :  { %1628 = vpow2.f32 %v1353_v6 }
 0xec0   :  { %v1629_v21 = vpop.eup %1628 }
 0xec1   :  { %v795_v23 = vadd.f32 1.0, %v1629_v21  ;;  %v1592_v21 = vld [vmem:[#allocation2 + $0x50] sm:$0xff]  }
 0xec3   :  { %1630 = vrcp.f32 %v795_v23 }
 0xecd   :  { %v1631_v1 = vpop.eup %1630 }
 0xece   :  { %v809_v11 = vsub.f32 1.0, %v1631_v1  ;;  %v815_v35 = vmul.f32 %v1631_v1, %v1997_v10 }
 0xf24   :  { %v800_v24 = vpop.permute.xlu1 %799 }
 0xf25   :  { %v802_v7 = vmul.f32 %v1631_v1, %v800_v24 }
 0xf27   :  { %804 = vrot.lane.b32.xlu0 %v802_v7, %s1743_s22 }
 0xf99   :  { %v805_v25 = vpop.permute.xlu0 %804 }
 0xf9a   :  { %v807_v26 = vadd.f32 %v805_v25, %v263_v19 }
 0xf9c   :  { %1632 = vtanh.f32 %v807_v26 }
 0xfa6   :  { %v1633_v27 = vpop.eup %1632 }
 0xfa7   :  { %811 = vrot.lane.b32.xlu1 %v1633_v27, %s1749_s18 }
0x1019   :  { %v812_v36 = vpop.permute.xlu1 %811 }
0x101a   :  { %v814_v37 = vmul.f32 %v812_v36, %v809_v11  ;;  %v1594_v11 = vld [vmem:[#allocation2 + $0x60] sm:$0xff]   ;;  %v1595_v36 = vld [vmem:[#allocation2 + $0x68] sm:$0xff]  }
0x101c   :  { %v816_v38 = vadd.f32 %v815_v35, %v814_v37  ;;  %v1596_v35 = vld [vmem:[#allocation2 + $0x70] sm:$0xff]   ;;  %v1597_v37 = vld [vmem:[#allocation2 + $0x78] sm:$0xff]  }
0x101e   :  { %v817_v39 = vpack.c.bf16 %v816_v38, %v816_v38  ;;  %v965_v17 = vpack.c.bf16 %v816_v38, %v1997_v10  ;;  %v1591_v10 = vld [vmem:[#allocation2 + $0x48] sm:$0xff]  }
0x1020   :  { %819 = vrot.lane.b32.xlu0 %v817_v39, %s1749_s18  ;;  %v1333_v39 = vld [vmem:[%s2120_s2 + $0x2] ss:$0 sm:$0xff] }
0x1092   :  { %v820_v40 = vpop.permute.xlu0 %819 }
0x1093   :  { %1504 = vmatmul.mubr.msk.bf16.vlgmr.msra.gmra.mrb[12].mxu0 %vm196_vm5, %v820_v40 }
0x1166   :  { %v858_v41 = vpop.f32.mrb[12].mxu0 }
0x1167   :  { %v859_v42 = vadd.f32 %v1843_v22, %v858_v41  ;;  %v1505_v43 = vpop.f32.mrb[13].mxu0 }
0x1168   :  { %v861_v44 = vpop.f32.mrb[14].mxu0 }
0x1169   :  { %872 = vrot.lane.b32.xlu1 %v859_v42, %s1743_s22  ;;  %v1506_v45 = vpop.f32.mrb[15].mxu0  ;;  %v864_v32 = vadd.f32 %v859_v42, %v268_v46 }
0x116b   :  { %v1355_v47 = vmul.f32 -1.442695, %v864_v32 }
0x116d   :  { %1634 = vpow2.f32 %v1355_v47 }
0x1177   :  { %v1635_v49 = vpop.eup %1634 }
0x1178   :  { %v868_v50 = vadd.f32 1.0, %v1635_v49 }
0x117a   :  { %1636 = vrcp.f32 %v868_v50 }
0x1184   :  { %v1637_v51 = vpop.eup %1636 }
0x1185   :  { %v882_v58 = vsub.f32 1.0, %v1637_v51  ;;  %v888_v30 = vmul.f32 %v1637_v51, %v816_v38 }
0x11db   :  { %v873_v52 = vpop.permute.xlu1 %872 }
0x11dc   :  { %v875_v53 = vmul.f32 %v1637_v51, %v873_v52 }
0x11de   :  { %877 = vrot.lane.b32.xlu0 %v875_v53, %s1743_s22 }
0x1250   :  { %v878_v33 = vpop.permute.xlu0 %877 }
0x1251   :  { %v880_v54 = vadd.f32 %v878_v33, %v268_v46 }
0x1253   :  { %1638 = vtanh.f32 %v880_v54 }
0x125d   :  { %v1639_v56 = vpop.eup %1638 }
0x125e   :  { %884 = vrot.lane.b32.xlu1 %v1639_v56, %s1749_s18 }
0x12d0   :  { %v885_v59 = vpop.permute.xlu1 %884 }
0x12d1   :  { %v887_v60 = vmul.f32 %v885_v59, %v882_v58 }
0x12d3   :  { %v889_v61 = vadd.f32 %v888_v30, %v887_v60 }
0x12d5   :  { %v890_v62 = vpack.c.bf16 %v889_v61, %v889_v61 }
0x12d7   :  { %892 = vrot.lane.b32.xlu0 %v890_v62, %s1749_s18 }
0x1349   :  { %v893_v63 = vpop.permute.xlu0 %892 }
0x134a   :  { %1512 = vmatmul.mubr.msk.bf16.vlgmr.msra.gmra.mrb[28].mxu1 %vm196_vm5, %v893_v63 }
0x134b   :  { %1516 = vmatpush3.bf16.msra.mxu1 %v1588_v29 }
0x134c   :  { %1517 = vmatprep.subr.bf16.mxu1 %v1589_v28 }
0x134f   :  { %1518 = vmatpush3.bf16.msra.mxu1 %v1589_v28 }
0x141d   :  { %v931_v0 = vpop.f32.mrb[28].mxu1 }
0x141e   :  { %v932_v2 = vadd.f32 %v1843_v22, %v931_v0  ;;  %v1513_v3 = vpop.f32.mrb[29].mxu1  ;;  %v963_v22 = vpack.c.bf16 %v1941_v55, %v1878_v57  ;;  %v964_v57 = vpack.c.bf16 %v1979_v48, %v1960_v18  ;;  %v1590_v55 = vld [vmem:[#allocation2 + $0x40] sm:$0xff]   ;;  %v1593_v48 = vld [vmem:[#allocation2 + $0x58] sm:$0xff]  }
0x141f   :  { %v934_v4 = vpop.f32.mrb[30].mxu1  ;;  %1527 = vmatprep.subr.bf16.mxu0 %v1590_v55 }
0x1420   :  { %945 = vrot.lane.b32.xlu1 %v932_v2, %s1743_s22  ;;  %v1514_v5 = vpop.f32.mrb[31].mxu1  ;;  %v937_v31 = vadd.f32 %v932_v2, %v271_v8  ;;  %1528 = vmatpush3.bf16.msra.mxu0 %v1590_v55 }
0x1421   :  { %1529 = vmatprep.subr.bf16.mxu0 %v1591_v10  ;;  %v1364_v5 = vld [vmem:[%s2120_s2 + $0x3] ss:$0 sm:$0xff]  ;;  %s1750_s2 = smov [#allocation5]  }
0x1422   :  { %v1357_v9 = vmul.f32 -1.442695, %v937_v31 }
0x1424   :  { %1640 = vpow2.f32 %v1357_v9  ;;  %1530 = vmatpush3.bf16.msra.mxu0 %v1591_v10 }
0x1425   :  { %1531 = vmatprep.subr.bf16.mxu0 %v1592_v21 }
0x1428   :  { %1532 = vmatpush3.bf16.msra.mxu0 %v1592_v21 }
0x1429   :  { %1533 = vmatprep.subr.bf16.mxu0 %v1593_v48 }
0x142c   :  { %1534 = vmatpush3.bf16.msra.mxu0 %v1593_v48 }
0x142d   :  { %1535 = vmatprep.subr.bf16.mxu0 %v1594_v11 }
0x142e   :  { %v1641_v12 = vpop.eup %1640 }
0x142f   :  { %v941_v13 = vadd.f32 1.0, %v1641_v12 }
0x1430   :  { %1536 = vmatpush3.bf16.msra.mxu0 %v1594_v11 }
0x1431   :  { %1642 = vrcp.f32 %v941_v13  ;;  %1537 = vmatprep.subr.bf16.mxu0 %v1595_v36 }
0x1434   :  { %1538 = vmatpush3.bf16.msra.mxu0 %v1595_v36 }
0x1435   :  { %1539 = vmatprep.subr.bf16.mxu0 %v1596_v35 }
0x1438   :  { %1540 = vmatpush3.bf16.msra.mxu0 %v1596_v35 }
0x1439   :  { %1541 = vmatprep.subr.bf16.mxu0 %v1597_v37 }
0x143b   :  { %v1643_v14 = vpop.eup %1642 }
0x143c   :  { %v955_v23 = vsub.f32 1.0, %v1643_v14  ;;  %v961_v24 = vmul.f32 %v1643_v14, %v889_v61  ;;  %1542 = vmatpush3.bf16.msra.mxu0 %v1597_v37 }
0x1492   :  { %v946_v15 = vpop.permute.xlu1 %945 }
0x1493   :  { %v948_v16 = vmul.f32 %v1643_v14, %v946_v15 }
0x1495   :  { %950 = vrot.lane.b32.xlu0 %v948_v16, %s1743_s22  ;;  %s1298_s22 = sshll.u32 %s1750_s2, 4  ;;  %s1299_s22 = int_to_ptr.vmem [resolvable:$true] %s1298_s22 }
0x1496   :  { %s1716_s23 = scalar_lea.vmem %s1299_s22, 1024  ;;  %p1721_p9 = scmp.lt.s32.totalorder %s1299_s22, %s1299_s22 }
0x1497   :  { %p1717_p8 = scmp.ne.s32.totalorder %s1299_s22, %s1716_s23  ;;  %p1722_p10 = scmp.lt.s32.totalorder %s1716_s23, %s1716_s23 }
0x1499   :  { %971 = vrot.lane.b32.xlu0 %v963_v22, %s1749_s18  ;;  %p1723_p11 = por %p1722_p10, %p1721_p9 }
0x149b   :  { %p1724_p12 = pnand %p1723_p11, %p1717_p8 }
0x149d   :  { %975 = vrot.lane.b32.xlu0 %v965_v17, %s1749_s18 }
0x1507   :  { %v951_v34 = vpop.permute.xlu0 %950 }
0x1508   :  { %v953_v19 = vadd.f32 %v951_v34, %v271_v8 }
0x150a   :  { %1644 = vtanh.f32 %v953_v19 }
0x150b   :  { %v972_v20 = vpop.permute.xlu0 %971 }
0x150c   :  { %1519 = vmatprep.mubr.msk.bf16.mxu1 %vm196_vm5, %v972_v20 }
0x150f   :  { %v976_v27 = vpop.permute.xlu0 %975 }
0x1514   :  { %v1645_v6 = vpop.eup %1644 }
0x1515   :  { %957 = vrot.lane.b32.xlu1 %v1645_v6, %s1749_s18 }
0x1519   :  { %973 = vrot.lane.b32.xlu1 %v964_v57, %s1749_s18 }
0x1587   :  { %v958_v1 = vpop.permute.xlu1 %957 }
0x1588   :  { %v960_v7 = vmul.f32 %v958_v1, %v955_v23 }
0x158a   :  { %v962_v25 = vadd.f32 %v961_v24, %v960_v7 }
0x158b   :  { %v974_v26 = vpop.permute.xlu1 %973 }
0x158c   :  { %1520 = vmatmul.mubr.msk.bf16.vlgmr.msra.gmra.mrb[8].mxu1 %vm196_vm5, %v974_v26  ;;  %v966_v18 = vpack.c.bf16 %v962_v25, %v889_v61 }
0x158d   :  { %1523 = vmatprep.mubr.msk.bf16.mxu1 %vm196_vm5, %v976_v27 }
0x158e   :  { %977 = vrot.lane.b32.xlu1 %v966_v18, %s1749_s18 }
0x1600   :  { %v978_v38 = vpop.permute.xlu1 %977 }
0x1601   :  { %1524 = vmatmul.mubr.msk.bf16.gmra.mrb[12].mxu1 %vm196_vm5, %v978_v38 }
0x165f   :  { %v1521_v40 = vpop.f32.mrb[8].mxu1 }
0x1660   :  { %v1551_v41 = vadd.f32 %v1521_v40, %v1333_v39  ;;  %v1037_v42 = vpop.f32.mrb[9].mxu1 }
0x1661   :  { %v1552_v43 = vadd.f32 %v1333_v39, %v1037_v42  ;;  %v1522_v44 = vpop.f32.mrb[10].mxu1 }
0x1662   :  { %1646 = vtanh.f32 %v1551_v41  ;;  %v1553_v45 = vadd.f32 %v1522_v44, %v1333_v39  ;;  %v1040_v46 = vpop.f32.mrb[11].mxu1 }
0x1663   :  { %1648 = vtanh.f32 %v1552_v43  ;;  %v1554_v32 = vadd.f32 %v1333_v39, %v1040_v46 }
0x1664   :  { %1650 = vtanh.f32 %v1553_v45 }
0x1665   :  { %1652 = vtanh.f32 %v1554_v32 }
0x166c   :  { %v1647_v47 = vpop.eup %1646 }
0x166d   :  { %v1649_v49 = vpop.eup %1648 }
0x166e   :  { %v1651_v50 = vpop.eup %1650 }
0x166f   :  { %v1653_v51 = vpop.eup %1652  ;;  %v1077_v52 = vpack.c.bf16 %v1651_v50, %v1647_v47 }
0x1670   :  { %v1076_v53 = vpack.c.bf16 %v1653_v51, %v1649_v49 }
0x1672   :  { %1543 = vmatprep.mubr.bf16.mxu0 %v1076_v53 }
0x1673   :  { %1544 = vmatmul.mubr.bf16.vlgmr.msra.gmra.mrb[16].mxu0 %v1077_v52 }
0x16d4   :  { %v1525_v33 = vpop.f32.mrb[12].mxu1 }
0x16d5   :  { %v1555_v54 = vadd.f32 %v1525_v33, %v1333_v39  ;;  %v1053_v56 = vpop.f32.mrb[13].mxu1 }
0x16d6   :  { %v1556_v58 = vadd.f32 %v1333_v39, %v1053_v56  ;;  %v1526_v59 = vpop.f32.mrb[14].mxu1 }
0x16d7   :  { %1654 = vtanh.f32 %v1555_v54  ;;  %v1557_v30 = vadd.f32 %v1526_v59, %v1333_v39  ;;  %v1056_v60 = vpop.f32.mrb[15].mxu1 }
0x16d8   :  { %1656 = vtanh.f32 %v1556_v58  ;;  %v1558_v61 = vadd.f32 %v1333_v39, %v1056_v60 }
0x16d9   :  { %1658 = vtanh.f32 %v1557_v30 }
0x16da   :  { %1660 = vtanh.f32 %v1558_v61 }
0x16e1   :  { %v1655_v62 = vpop.eup %1654 }
0x16e2   :  { %v1657_v63 = vpop.eup %1656 }
0x16e3   :  { %v1659_v0 = vpop.eup %1658 }
0x16e4   :  { %v1661_v2 = vpop.eup %1660  ;;  %v1079_v3 = vpack.c.bf16 %v1659_v0, %v1655_v62 }
0x16e5   :  { %v1078_v4 = vpack.c.bf16 %v1661_v2, %v1657_v63 }
0x16e7   :  { %1547 = vmatprep.mubr.bf16.mxu0 %v1078_v4 }
0x16e8   :  { %1548 = vmatmul.mubr.bf16.gmra.mrb[20].mxu0 %v1079_v3 }
0x1746   :  { %v1545_v8 = vpop.f32.mrb[16].mxu0 }
0x1747   :  { %v1166_v31 = vpop.f32.mrb[17].mxu0  ;;  %v2055_v15 = vadd.f32 %v1545_v8, %v1364_v5 }
0x1748   :  { %v2050_v9 = vadd.f32 %v1364_v5, %v1166_v31  ;;  %v1546_v12 = vpop.f32.mrb[18].mxu0 }
0x1749   :  { %v1169_v13 = vpop.f32.mrb[19].mxu0  ;;  %v2059_v16 = vadd.f32 %v1546_v12, %v1364_v5 }
0x174a   :  { %v2052_v14 = vadd.f32 %v1364_v5, %v1169_v13  ;;  %1197 = vmax.xlane.f32.xlu0 %v2050_v9 }
0x174c   :  { %1199 = vmax.xlane.f32.xlu1 %v2052_v14 }
0x174e   :  { %1201 = vmax.xlane.f32.xlu0 %v2055_v15 }
0x1752   :  { %1203 = vmax.xlane.f32.xlu0 %v2059_v16 }
0x17bb   :  { %v1549_v22 = vpop.f32.mrb[20].mxu0 }
0x17bc   :  { %v1182_v29 = vpop.f32.mrb[21].mxu0  ;;  %v2067_v20 = vadd.f32 %v1549_v22, %v1364_v5 }
0x17bd   :  { %v2062_v17 = vadd.f32 %v1364_v5, %v1182_v29  ;;  %v1550_v28 = vpop.f32.mrb[22].mxu0 }
0x17be   :  { %v1185_v34 = vpop.f32.mrb[23].mxu0  ;;  %v2070_v6 = vadd.f32 %v1550_v28, %v1364_v5 }
0x17bf   :  { %v2064_v19 = vadd.f32 %v1364_v5, %v1185_v34  ;;  %1205 = vmax.xlane.f32.xlu1 %v2062_v17 }
0x17c1   :  { %1207 = vmax.xlane.f32.xlu0 %v2064_v19 }
0x17c3   :  { %1209 = vmax.xlane.f32.xlu1 %v2067_v20 }
0x17c5   :  { %1211 = vmax.xlane.f32.xlu0 %v2070_v6 }
0x17d7   :  { %v1198_v57 = vpop.xlane.xlu0 %1197 }
0x17d8   :  { %v1213_v55 = vsub.f32 %v2050_v9, %v1198_v57 }
0x17d9   :  { %v1200_v10 = vpop.xlane.xlu1 %1199 }
0x17da   :  { %v1221_v21 = vmul.f32 1.442695, %v1213_v55  ;;  %v1214_v23 = vsub.f32 %v2052_v14, %v1200_v10 }
0x17db   :  { %v1202_v1 = vpop.xlane.xlu0 %1201 }
0x17dc   :  { %1662 = vpow2.f32 %v1221_v21  ;;  %v1223_v24 = vmul.f32 1.442695, %v1214_v23  ;;  %v1215_v7 = vsub.f32 %v2055_v15, %v1202_v1 }
0x17de   :  { %1664 = vpow2.f32 %v1223_v24  ;;  %v1225_v25 = vmul.f32 1.442695, %v1215_v7 }
0x17df   :  { %v1204_v26 = vpop.xlane.xlu0 %1203 }
0x17e0   :  { %1666 = vpow2.f32 %v1225_v25  ;;  %v1216_v27 = vsub.f32 %v2059_v16, %v1204_v26 }
0x17e2   :  { %v1227_v18 = vmul.f32 1.442695, %v1216_v27 }
0x17e4   :  { %1668 = vpow2.f32 %v1227_v18 }
0x17e6   :  { %v1663_v48 = vpop.eup %1662 }
0x17e7   :  { %1237 = vadd.xlane.f32.xlu1 %v1663_v48 }
0x17e8   :  { %v1665_v11 = vpop.eup %1664 }
0x17e9   :  { %1239 = vadd.xlane.f32.xlu0 %v1665_v11 }
0x17ea   :  { %v1667_v36 = vpop.eup %1666 }
0x17eb   :  { %1241 = vadd.xlane.f32.xlu1 %v1667_v36 }
0x17ee   :  { %v1669_v35 = vpop.eup %1668 }
0x17ef   :  { %1243 = vadd.xlane.f32.xlu0 %v1669_v35 }
0x184c   :  { %v2078_v37 = vpop.xlane.xlu1 %1205 }
0x184d   :  { %v1217_v38 = vsub.f32 %v2062_v17, %v2078_v37 }
0x184e   :  { %v2082_v39 = vpop.xlane.xlu0 %1207 }
0x184f   :  { %v1229_v40 = vmul.f32 1.442695, %v1217_v38  ;;  %v1218_v41 = vsub.f32 %v2064_v19, %v2082_v39 }
0x1850   :  { %v2086_v42 = vpop.xlane.xlu1 %1209 }
0x1851   :  { %1670 = vpow2.f32 %v1229_v40  ;;  %v1231_v43 = vmul.f32 1.442695, %v1218_v41  ;;  %v1219_v44 = vsub.f32 %v2067_v20, %v2086_v42 }
0x1852   :  { %v2090_v45 = vpop.xlane.xlu0 %1211 }
0x1853   :  { %1672 = vpow2.f32 %v1231_v43  ;;  %v1233_v46 = vmul.f32 1.442695, %v1219_v44  ;;  %v1220_v32 = vsub.f32 %v2070_v6, %v2090_v45 }
0x1855   :  { %1674 = vpow2.f32 %v1233_v46  ;;  %v1235_v47 = vmul.f32 1.442695, %v1220_v32 }
0x1857   :  { %1676 = vpow2.f32 %v1235_v47 }
0x185b   :  { %v1671_v49 = vpop.eup %1670 }
0x185c   :  { %1245 = vadd.xlane.f32.xlu1 %v1671_v49 }
0x185d   :  { %v1673_v50 = vpop.eup %1672 }
0x185e   :  { %1247 = vadd.xlane.f32.xlu0 %v1673_v50 }
0x185f   :  { %v1675_v51 = vpop.eup %1674 }
0x1860   :  { %1249 = vadd.xlane.f32.xlu1 %v1675_v51 }
0x1861   :  { %v1677_v52 = vpop.eup %1676 }
0x1862   :  { %1251 = vadd.xlane.f32.xlu0 %v1677_v52 }
0x1874   :  { %v1238_v53 = vpop.xlane.xlu1 %1237 }
0x1875   :  { %1678 = vlog2.f32 %v1238_v53 }
0x1876   :  { %v1240_v33 = vpop.xlane.xlu0 %1239 }
0x1877   :  { %1680 = vlog2.f32 %v1240_v33 }
0x1878   :  { %v1242_v54 = vpop.xlane.xlu1 %1241 }
0x1879   :  { %1682 = vlog2.f32 %v1242_v54 }
0x187c   :  { %v1244_v56 = vpop.xlane.xlu0 %1243 }
0x187d   :  { %1684 = vlog2.f32 %v1244_v56 }
0x187f   :  { %v1679_v58 = vpop.eup %1678 }
0x1880   :  { %v1254_v59 = vmul.f32 0.6931472, %v1679_v58 }
0x1881   :  { %v1681_v30 = vpop.eup %1680 }
0x1882   :  { %v1269_v60 = vadd.f32 %v1254_v59, %v1198_v57  ;;  %v1256_v61 = vmul.f32 0.6931472, %v1681_v30 }
0x1883   :  { %v1683_v62 = vpop.eup %1682 }
0x1884   :  { %v1277_v63 = vsub.f32 %v2050_v9, %v1269_v60  ;;  %v1270_v0 = vadd.f32 %v1256_v61, %v1200_v10  ;;  %v1258_v2 = vmul.f32 0.6931472, %v1683_v62 }
0x1886   :  { %1285 = vst [vmem:[#allocation5] sm:$0xff] %v1277_v63  ;;  %v1278_v3 = vsub.f32 %v2052_v14, %v1270_v0  ;;  %v1271_v4 = vadd.f32 %v1258_v2, %v1202_v1 }
0x1887   :  { %v1685_v5 = vpop.eup %1684 }
0x1888   :  { %1286 = vst [vmem:[#allocation5 + $0x8] sm:$0xff] %v1278_v3  ;;  %v1279_v8 = vsub.f32 %v2055_v15, %v1271_v4  ;;  %v1260_v31 = vmul.f32 0.6931472, %v1685_v5 }
0x188a   :  { %1287 = vst [vmem:[#allocation5 + $0x10] sm:$0xff] %v1279_v8  ;;  %v1272_v12 = vadd.f32 %v1260_v31, %v1204_v26 }
0x188c   :  { %v1280_v13 = vsub.f32 %v2059_v16, %v1272_v12 }
0x188e   :  { %1288 = vst [vmem:[#allocation5 + $0x18] sm:$0xff] %v1280_v13 }
0x18e9   :  { %v1246_v22 = vpop.xlane.xlu1 %1245 }
0x18ea   :  { %1686 = vlog2.f32 %v1246_v22 }
0x18eb   :  { %v1248_v29 = vpop.xlane.xlu0 %1247 }
0x18ec   :  { %1688 = vlog2.f32 %v1248_v29 }
0x18ed   :  { %v1250_v9 = vpop.xlane.xlu1 %1249 }
0x18ee   :  { %1690 = vlog2.f32 %v1250_v9 }
0x18ef   :  { %v1252_v28 = vpop.xlane.xlu0 %1251 }
0x18f0   :  { %1692 = vlog2.f32 %v1252_v28 }
0x18f4   :  { %v1687_v14 = vpop.eup %1686 }
0x18f5   :  { %v1262_v34 = vmul.f32 0.6931472, %v1687_v14 }
0x18f6   :  { %v1689_v57 = vpop.eup %1688 }
0x18f7   :  { %v1273_v55 = vadd.f32 %v1262_v34, %v2078_v37  ;;  %v1264_v15 = vmul.f32 0.6931472, %v1689_v57 }
0x18f8   :  { %v1691_v10 = vpop.eup %1690 }
0x18f9   :  { %v1281_v21 = vsub.f32 %v2062_v17, %v1273_v55  ;;  %v1274_v16 = vadd.f32 %v1264_v15, %v2082_v39  ;;  %v1266_v23 = vmul.f32 0.6931472, %v1691_v10 }
0x18fa   :  { %v1693_v1 = vpop.eup %1692 }
0x18fb   :  { %1289 = vst [vmem:[#allocation5 + $0x20] sm:$0xff] %v1281_v21  ;;  %v1282_v24 = vsub.f32 %v2064_v19, %v1274_v16  ;;  %v1275_v7 = vadd.f32 %v1266_v23, %v2086_v42  ;;  %v1268_v25 = vmul.f32 0.6931472, %v1693_v1 }
0x18fd   :  { %1290 = vst [vmem:[#allocation5 + $0x28] sm:$0xff] %v1282_v24  ;;  %v1283_v26 = vsub.f32 %v2067_v20, %v1275_v7  ;;  %v1276_v27 = vadd.f32 %v1268_v25, %v2090_v45 }
0x18ff   :  { %1291 = vst [vmem:[#allocation5 + $0x30] sm:$0xff] %v1283_v26  ;;  %v1284_v17 = vsub.f32 %v2070_v6, %v1276_v27 }
0x1901   :  { %1292 = vst [vmem:[#allocation5 + $0x38] sm:$0xff] %v1284_v17 }
0x1902   :  { %1727 = shalt.err (!%p1724_p12)
}
0x1903   :  { %s1728_s26 = scalar_lea.hbm %s2121_s3, 1024 }
0x1904   :  { %p1729_p13 = scmp.ne.s32.totalorder %s2121_s3, %s1728_s26  ;;  %p1732_p0 = scmp.lt.u32.totalorder %s1728_s26, %s2121_s3 }
0x1906   :  { %p1734_p1 = pnand %p1732_p0, %p1729_p13 }
0x1908   :  { %1737 = shalt.err (!%p1734_p1)
}
0x1909   :  { %s1751_s30 = smov 128   ;;  %s1752_s4 = smov 8  }
0x190a   :  { %1304 = dma.vmem_to_hbm [thread:$0]  %s1299_s22, 1024, %s2121_s3, [#allocation4], %s1751_s30, %s1751_s30, %s1752_s4  }
0x190b   :  { %1740 = dma.done.wait [#allocation4], 1024  }
0x190c   :  { %1741 = vsyncadd [#allocation4], 4294966272 }
0x190d   :  { %1308 = vsyncpa [#allocation3], 1 }
0x190e   :  { %1309 = vsyncpa [#allocation4], 1 }

</bundles_post_ra>
